<compile_context>
chip_gen: v7x
topology: tpu7x:2x2x1
jax: 0.10.0
libtpu: 0.0.40
codegen_flags: <defaults>
</compile_context>

<pallas_src>
import functools

import jax
import jax.numpy as jnp
from jax.experimental import pallas as pl
from jax.experimental.pallas import tpu as pltpu

BN_EPS = 1e-5
_MAX_UNROLLED_LAYERS = 8   # beyond this, use lax.fori_loop inside the kernel
_LANE = 128                # TPU lane width; hidden dim is padded to a multiple of this


def _round_up(n, m):
    return ((n + m - 1) // m) * m


def _bn_train(h, gamma, beta):
    """BatchNorm1d, training mode, two-pass variance (matches PyTorch semantics and
    avoids E[h^2]-mean^2 cancellation).  All math in f32."""
    mean = jnp.mean(h, axis=0, keepdims=True)
    centered = h - mean
    var = jnp.mean(centered * centered, axis=0, keepdims=True)
    scale = gamma * jax.lax.rsqrt(var + BN_EPS)
    return centered * scale + beta


def _coupling_layer(x1m, x2, ld_wide, w1, w2, w3s, w3t, vecs, b3):
    """One AffineCoupling layer acting on the carried (x2, lane-wide log-det) state.

    x1m: (B, d2) in the matmul dtype (bf16 fast path / f32 exact path).
    x2, ld_wide: (B, d2) f32.
    w1/w2/w3s/w3t: matmul-dtype weights (log_s / t heads pre-split).
    vecs: (8, H) f32 rows = [b1, g1, be1, b2, g2, be2, 0, 0];  b3: (2, d2) f32.
    """
    b1, g1, be1 = vecs[0:1, :], vecs[1:2, :], vecs[2:3, :]
    b2, g2, be2 = vecs[3:4, :], vecs[4:5, :], vecs[5:6, :]
    b3s, b3t = b3[0:1, :], b3[1:2, :]

    # net = Linear -> ReLU -> BN -> Linear -> ReLU -> BN -> Linear
    # MXU operands in the matmul dtype, f32 accumulation; biases/BN math in f32.
    h = jnp.dot(x1m, w1, preferred_element_type=jnp.float32) + b1
    h = _bn_train(jnp.maximum(h, 0.0), g1, be1)
    h = jnp.dot(h.astype(w2.dtype), w2, preferred_element_type=jnp.float32) + b2
    h = _bn_train(jnp.maximum(h, 0.0), g2, be2)
    hm = h.astype(w3s.dtype)
    log_s_pre = jnp.dot(hm, w3s, preferred_element_type=jnp.float32) + b3s
    t = jnp.dot(hm, w3t, preferred_element_type=jnp.float32) + b3t

    z = log_s_pre + 2.0
    # log(sigmoid(z)) = -softplus(-z): stable (never log(0)); the log argument is in
    # (1, 2], so plain log is as accurate as log1p here.
    log_s = -(jnp.maximum(-z, 0.0) + jnp.log(1.0 + jnp.exp(-jnp.abs(z))))
    s = jnp.exp(log_s)

    return s * x2 + t, ld_wide + log_s


def _realnvp_kernel(x1_ref, x2_ref, w1_ref, w2_ref, w3s_ref, w3t_ref,
                    vec_ref, b3_ref, y2_ref, ld_ref, *, use_fori_loop):
    n_layers = w1_ref.shape[0]

    x1m = x1_ref[...].astype(w1_ref.dtype)   # identity half; cast once for the MXU
    x2 = x2_ref[...]                          # carried half (f32)
    ld = jnp.zeros_like(x2)                   # lane-wide log-det accumulator (f32)

    def layer(l, x2, ld):
        return _coupling_layer(x1m, x2, ld, w1_ref[l], w2_ref[l],
                               w3s_ref[l], w3t_ref[l], vec_ref[l], b3_ref[l])

    if use_fori_loop:
        # Large-L path: dynamic leading-axis ref indexing keeps vreg live ranges and
        # compile time bounded instead of inflating them with a huge static unroll.
        def body(l, carry):
            return layer(l, *carry)
        x2, ld = jax.lax.fori_loop(0, n_layers, body, (x2, ld))
    else:
        for l in range(n_layers):             # small L: fully unrolled, static indices
            x2, ld = layer(l, x2, ld)

    y2_ref[...] = x2
    ld_ref[...] = jnp.sum(ld, axis=1, keepdims=True)


def realnvp_forward(x, params, *, use_bf16_matmul=True, force_layer_loop=False):
    """Forward pass of RealNVP.

    x: (B, dim) float32 (dim even).
    params: stacked per-layer parameters (leading axis = n_layers); Linear weights are
            stored (in_features, out_features) so y = x @ W + b.
    Returns (y (B, dim), log_det (B,)).
    """
    B, dim = x.shape
    n_layers, d2, hidden = params["w1"].shape
    assert dim == 2 * d2, "dim must be even (matches the PyTorch split semantics)"

    f32 = jnp.float32
    mm_dtype = jnp.bfloat16 if use_bf16_matmul else f32

    # Lane-dense halves of the state (the flow never modifies x1).
    x1 = x[:, :d2]
    x2 = x[:, d2:]

    # Pad the hidden dim to a lane multiple.  Padded weights and gamma/beta are zero,
    # so padded features are exactly zero everywhere and contribute nothing.
    hp = _round_up(hidden, _LANE)
    ph = hp - hidden
    w1 = jnp.pad(params["w1"], ((0, 0), (0, 0), (0, ph)))
    w2 = jnp.pad(params["w2"], ((0, 0), (0, ph), (0, ph)))
    w3 = jnp.pad(params["w3"], ((0, 0), (0, ph), (0, 0)))

    # Pre-split the output head so log_s / t never need an in-kernel lane split.
    w3s = w3[:, :, :d2]
    w3t = w3[:, :, d2:]
    b3pack = jnp.stack([params["b3"][:, :d2], params["b3"][:, d2:]], axis=1)  # (L,2,d2)

    def padh(v):
        return jnp.pad(v, ((0, 0), (0, ph)))
    zeros_h = jnp.zeros((n_layers, hp), f32)
    vecs = jnp.stack([padh(params["b1"]), padh(params["g1"]), padh(params["be1"]),
                      padh(params["b2"]), padh(params["g2"]), padh(params["be2"]),
                      zeros_h, zeros_h], axis=1)                              # (L,8,Hp)

    # bf16 MXU operands: cast weights once in the wrapper (halves DMA bytes / VMEM
    # residency); biases, BN params and all vector math stay f32.
    w1 = w1.astype(mm_dtype)
    w2 = w2.astype(mm_dtype)
    w3s = w3s.astype(mm_dtype)
    w3t = w3t.astype(mm_dtype)

    use_fori = force_layer_loop or (n_layers > _MAX_UNROLLED_LAYERS)
    kernel = functools.partial(_realnvp_kernel, use_fori_loop=use_fori)

    # Explicit VMEM budget: resident blocks x2 (double-buffer headroom) + 2 MiB slack,
    # floored at 16 MiB, capped at v7x's 64 MiB physical VMEM.
    wbytes = 2 if use_bf16_matmul else 4
    resident = ((3 * B * d2 + B) * 4
                + n_layers * (d2 * hp + hp * hp + 2 * hp * d2) * wbytes
                + n_layers * (8 * hp + 2 * d2) * 4)
    vmem_limit = int(min(max(2 * resident + (2 << 20), 16 << 20), 64 << 20))

    y2, ld = pl.pallas_call(
        kernel,
        out_shape=(
            jax.ShapeDtypeStruct((B, d2), f32),
            jax.ShapeDtypeStruct((B, 1), f32),
        ),
        grid_spec=pltpu.PrefetchScalarGridSpec(
            num_scalar_prefetch=0,
            grid=(1,),
            in_specs=[
                pl.BlockSpec((B, d2), lambda i: (0, 0)),                  # x1
                pl.BlockSpec((B, d2), lambda i: (0, 0)),                  # x2
                pl.BlockSpec((n_layers, d2, hp), lambda i: (0, 0, 0)),    # w1
                pl.BlockSpec((n_layers, hp, hp), lambda i: (0, 0, 0)),    # w2
                pl.BlockSpec((n_layers, hp, d2), lambda i: (0, 0, 0)),    # w3 (log_s head)
                pl.BlockSpec((n_layers, hp, d2), lambda i: (0, 0, 0)),    # w3 (t head)
                pl.BlockSpec((n_layers, 8, hp), lambda i: (0, 0, 0)),     # packed bias/BN vecs
                pl.BlockSpec((n_layers, 2, d2), lambda i: (0, 0, 0)),     # packed b3 halves
            ],
            out_specs=[
                pl.BlockSpec((B, d2), lambda i: (0, 0)),                  # y2
                pl.BlockSpec((B, 1), lambda i: (0, 0)),                   # log_det
            ],
        ),
        compiler_params=pltpu.CompilerParams(
            dimension_semantics=("arbitrary",),
            vmem_limit_bytes=vmem_limit,
        ),
    )(x1, x2, w1, w2, w3s, w3t, vecs, b3pack)

    # d2 (=4 here) is not a lane multiple, so the kernel keeps lane-dense (B, d2) halves
    # and the concat stays in the wrapper; with d2 % 128 == 0 the kernel would instead
    # write the full (B, dim) y (or alias x via input_output_aliases) and skip this
    # extra HBM round trip.
    y = jnp.concatenate([x1, y2], axis=1)
    return y, ld[:, 0]


def realnvp_reference(x, params, *, bf16_matmul=False):
    """Pure-JAX reference mirroring the PyTorch module (BatchNorm in training mode).
    With bf16_matmul=True the matmul operands are cast to bf16 (f32 accumulation),
    matching the kernel's fast path for an apples-to-apples comparison."""
    B, dim = x.shape
    d2 = dim // 2
    mmdt = jnp.bfloat16 if bf16_matmul else jnp.float32
    ld = jnp.zeros((B,), jnp.float32)
    n_layers = params["w1"].shape[0]

    def bn(h, g, b):
        m = h.mean(0, keepdims=True)
        c = h - m
        v = (c * c).mean(0, keepdims=True)
        return c * (g * jax.lax.rsqrt(v + BN_EPS)) + b

    for l in range(n_layers):
        x1, x2 = x[:, :d2], x[:, d2:]
        h = jnp.dot(x1.astype(mmdt), params["w1"][l].astype(mmdt),
                    preferred_element_type=jnp.float32) + params["b1"][l]
        h = bn(jnp.maximum(h, 0.0), params["g1"][l], params["be1"][l])
        h = jnp.dot(h.astype(mmdt), params["w2"][l].astype(mmdt),
                    preferred_element_type=jnp.float32) + params["b2"][l]
        h = bn(jnp.maximum(h, 0.0), params["g2"][l], params["be2"][l])
        out = jnp.dot(h.astype(mmdt), params["w3"][l].astype(mmdt),
                      preferred_element_type=jnp.float32) + params["b3"][l]
        log_s, t = out[:, :d2], out[:, d2:]
        s = jax.nn.sigmoid(log_s + 2.0)
        x = jnp.concatenate([x1, s * x2 + t], axis=1)
        ld = ld + jnp.sum(jnp.log(s), axis=1)
    return x, ld


def init_params(key, dim, hidden_dim, n_layers):
    d2 = dim // 2
    keys = jax.random.split(key, 6)

    def lin_init(k, fan_in, shape):
        bound = 1.0 / jnp.sqrt(fan_in)
        return jax.random.uniform(k, shape, jnp.float32, -bound, bound)

    return {
        "w1": lin_init(keys[0], d2, (n_layers, d2, hidden_dim)),
        "b1": lin_init(keys[1], d2, (n_layers, hidden_dim)),
        "g1": jnp.ones((n_layers, hidden_dim), jnp.float32),
        "be1": jnp.zeros((n_layers, hidden_dim), jnp.float32),
        "w2": lin_init(keys[2], hidden_dim, (n_layers, hidden_dim, hidden_dim)),
        "b2": lin_init(keys[3], hidden_dim, (n_layers, hidden_dim)),
        "g2": jnp.ones((n_layers, hidden_dim), jnp.float32),
        "be2": jnp.zeros((n_layers, hidden_dim), jnp.float32),
        "w3": lin_init(keys[4], hidden_dim, (n_layers, hidden_dim, dim)),
        "b3": lin_init(keys[5], hidden_dim, (n_layers, dim)),
    }


if __name__ == "__main__":
    B, DIM, HIDDEN, N_LAYERS = 8, 8, 32, 4

    key = jax.random.PRNGKey(0)
    kx, kp = jax.random.split(key)
    x = jax.random.normal(kx, (B, DIM), jnp.float32)
    params = init_params(kp, DIM, HIDDEN, N_LAYERS)

    # 1) Exact (f32-operand) path vs the PyTorch-semantics reference: tight tolerance.
    fwd_f32 = jax.jit(lambda x, p: realnvp_forward(x, p, use_bf16_matmul=False))
    y32, ld32 = jax.block_until_ready(fwd_f32(x, params))
    y_ref, ld_ref = realnvp_reference(x, params)
    assert jnp.allclose(y32, y_ref, rtol=1e-4, atol=1e-4), "f32 path: y mismatch"
    assert jnp.allclose(ld32, ld_ref, rtol=1e-4, atol=1e-4), "f32 path: log_det mismatch"

    # 2) Fast path (bf16 MXU operands, f32 accumulation) vs a bf16-matmul reference.
    fwd_bf16 = jax.jit(lambda x, p: realnvp_forward(x, p, use_bf16_matmul=True))
    y16, ld16 = jax.block_until_ready(fwd_bf16(x, params))
    y_ref16, ld_ref16 = realnvp_reference(x, params, bf16_matmul=True)
    assert jnp.allclose(y16, y_ref16, rtol=1e-3, atol=1e-3), "bf16 path: y mismatch"
    assert jnp.allclose(ld16, ld_ref16, rtol=1e-3, atol=1e-3), "bf16 path: log_det mismatch"

    # 3) Large-L code path (in-kernel lax.fori_loop with dynamic layer indexing).
    fwd_loop = jax.jit(lambda x, p: realnvp_forward(x, p, force_layer_loop=True))
    yl, ldl = jax.block_until_ready(fwd_loop(x, params))
    assert jnp.allclose(yl, y_ref16, rtol=1e-3, atol=1e-3), "fori path: y mismatch"
    assert jnp.allclose(ldl, ld_ref16, rtol=1e-3, atol=1e-3), "fori path: log_det mismatch"

    print("KERNEL_OK")
</pallas_src>

<mosaic_0001>
module attributes {stable_mosaic.version = 11 : i64} {
  func.func @_realnvp_kernel(%arg0: i32, %arg1: memref<8x4xf32, #tpu.memory_space<vmem>>, %arg2: memref<8x4xf32, #tpu.memory_space<vmem>>, %arg3: memref<4x4x128xf32, #tpu.memory_space<vmem>>, %arg4: memref<4x128x128xf32, #tpu.memory_space<vmem>>, %arg5: memref<4x128x4xf32, #tpu.memory_space<vmem>>, %arg6: memref<4x128x4xf32, #tpu.memory_space<vmem>>, %arg7: memref<4x8x128xf32, #tpu.memory_space<vmem>>, %arg8: memref<4x2x4xf32, #tpu.memory_space<vmem>>, %arg9: memref<8x4xf32, #tpu.memory_space<vmem>>, %arg10: memref<8x1xf32, #tpu.memory_space<vmem>>) attributes {dimension_semantics = [#tpu.dimension_semantics<arbitrary>], iteration_bounds = array<i64: 1>, scalar_prefetch = 0 : i64, scratch_operands = 0 : i64, tpu.core_type = #tpu.core_type<tc>, window_params = [{pipeline_mode = #tpu.pipeline_mode<synchronous>, transform_indices = @transform_0, window_bounds = array<i64: 8, 4>}, {pipeline_mode = #tpu.pipeline_mode<synchronous>, transform_indices = @transform_1, window_bounds = array<i64: 8, 4>}, {pipeline_mode = #tpu.pipeline_mode<synchronous>, transform_indices = @transform_2, window_bounds = array<i64: 4, 4, 128>}, {pipeline_mode = #tpu.pipeline_mode<synchronous>, transform_indices = @transform_3, window_bounds = array<i64: 4, 128, 128>}, {pipeline_mode = #tpu.pipeline_mode<synchronous>, transform_indices = @transform_4, window_bounds = array<i64: 4, 128, 4>}, {pipeline_mode = #tpu.pipeline_mode<synchronous>, transform_indices = @transform_5, window_bounds = array<i64: 4, 128, 4>}, {pipeline_mode = #tpu.pipeline_mode<synchronous>, transform_indices = @transform_6, window_bounds = array<i64: 4, 8, 128>}, {pipeline_mode = #tpu.pipeline_mode<synchronous>, transform_indices = @transform_7, window_bounds = array<i64: 4, 2, 4>}, {pipeline_mode = #tpu.pipeline_mode<synchronous>, transform_indices = @transform_8, window_bounds = array<i64: 8, 4>}, {pipeline_mode = #tpu.pipeline_mode<synchronous>, transform_indices = @transform_9, window_bounds = array<i64: 8, 1>}]} {
    %c0 = arith.constant 0 : index
    %c0_0 = arith.constant 0 : index
    %0 = vector.load %arg1[%c0, %c0_0] : memref<8x4xf32, #tpu.memory_space<vmem>>, vector<8x4xf32>
    %c0_1 = arith.constant 0 : index
    %c0_2 = arith.constant 0 : index
    %1 = vector.load %arg2[%c0_1, %c0_2] : memref<8x4xf32, #tpu.memory_space<vmem>>, vector<8x4xf32>
    %cst = arith.constant 0.000000e+00 : f32
    %2 = vector.broadcast %cst : f32 to vector<8x4xf32>
    %c0_3 = arith.constant 0 : index
    %c0_4 = arith.constant 0 : index
    %c0_5 = arith.constant 0 : index
    %3 = vector.load %arg3[%c0_3, %c0_4, %c0_5] : memref<4x4x128xf32, #tpu.memory_space<vmem>>, vector<1x4x128xf32>
    %4 = vector.shape_cast %3 : vector<1x4x128xf32> to vector<4x128xf32>
    %c0_6 = arith.constant 0 : index
    %c0_7 = arith.constant 0 : index
    %c0_8 = arith.constant 0 : index
    %5 = vector.load %arg4[%c0_6, %c0_7, %c0_8] : memref<4x128x128xf32, #tpu.memory_space<vmem>>, vector<1x128x128xf32>
    %6 = vector.shape_cast %5 : vector<1x128x128xf32> to vector<128x128xf32>
    %c0_9 = arith.constant 0 : index
    %c0_10 = arith.constant 0 : index
    %c0_11 = arith.constant 0 : index
    %7 = vector.load %arg5[%c0_9, %c0_10, %c0_11] : memref<4x128x4xf32, #tpu.memory_space<vmem>>, vector<1x128x4xf32>
    %8 = vector.shape_cast %7 : vector<1x128x4xf32> to vector<128x4xf32>
    %c0_12 = arith.constant 0 : index
    %c0_13 = arith.constant 0 : index
    %c0_14 = arith.constant 0 : index
    %9 = vector.load %arg6[%c0_12, %c0_13, %c0_14] : memref<4x128x4xf32, #tpu.memory_space<vmem>>, vector<1x128x4xf32>
    %10 = vector.shape_cast %9 : vector<1x128x4xf32> to vector<128x4xf32>
    %c0_15 = arith.constant 0 : index
    %c0_16 = arith.constant 0 : index
    %c0_17 = arith.constant 0 : index
    %11 = vector.load %arg7[%c0_15, %c0_16, %c0_17] : memref<4x8x128xf32, #tpu.memory_space<vmem>>, vector<1x8x128xf32>
    %12 = vector.shape_cast %11 : vector<1x8x128xf32> to vector<8x128xf32>
    %c0_18 = arith.constant 0 : index
    %c0_19 = arith.constant 0 : index
    %c0_20 = arith.constant 0 : index
    %13 = vector.load %arg8[%c0_18, %c0_19, %c0_20] : memref<4x2x4xf32, #tpu.memory_space<vmem>>, vector<1x2x4xf32>
    %14 = vector.shape_cast %13 : vector<1x2x4xf32> to vector<2x4xf32>
    %15 = vector.extract_strided_slice %12 {offsets = [0, 0], sizes = [1, 128], strides = [1, 1]} : vector<8x128xf32> to vector<1x128xf32>
    %16 = vector.extract_strided_slice %12 {offsets = [1, 0], sizes = [1, 128], strides = [1, 1]} : vector<8x128xf32> to vector<1x128xf32>
    %17 = vector.extract_strided_slice %12 {offsets = [2, 0], sizes = [1, 128], strides = [1, 1]} : vector<8x128xf32> to vector<1x128xf32>
    %18 = vector.extract_strided_slice %12 {offsets = [3, 0], sizes = [1, 128], strides = [1, 1]} : vector<8x128xf32> to vector<1x128xf32>
    %19 = vector.extract_strided_slice %12 {offsets = [4, 0], sizes = [1, 128], strides = [1, 1]} : vector<8x128xf32> to vector<1x128xf32>
    %20 = vector.extract_strided_slice %12 {offsets = [5, 0], sizes = [1, 128], strides = [1, 1]} : vector<8x128xf32> to vector<1x128xf32>
    %21 = vector.extract_strided_slice %14 {offsets = [0, 0], sizes = [1, 4], strides = [1, 1]} : vector<2x4xf32> to vector<1x4xf32>
    %22 = vector.extract_strided_slice %14 {offsets = [1, 0], sizes = [1, 4], strides = [1, 1]} : vector<2x4xf32> to vector<1x4xf32>
    %cst_21 = arith.constant dense<0.000000e+00> : vector<8x128xf32>
    %23 = tpu.matmul %0, %4, %cst_21 {dimension_numbers = #tpu.dot_dimension_numbers<[1], [0], [0], [1], [0, 0, 1, 1], [], []>} : vector<8x4xf32>, vector<4x128xf32>, vector<8x128xf32> -> vector<8x128xf32>
    %24 = vector.broadcast %15 : vector<1x128xf32> to vector<8x128xf32>
    %25 = arith.addf %23, %24 : vector<8x128xf32>
    %cst_22 = arith.constant 0.000000e+00 : f32
    %26 = vector.broadcast %cst_22 : f32 to vector<8x128xf32>
    %27 = arith.maximumf %25, %26 : vector<8x128xf32>
    %cst_23 = arith.constant dense<0.000000e+00> : vector<128xf32>
    %28 = vector.multi_reduction <add>, %27, %cst_23 [0] : vector<8x128xf32> to vector<128xf32>
    %29 = vector.shape_cast %28 : vector<128xf32> to vector<1x128xf32>
    %cst_24 = arith.constant 8.000000e+00 : f32
    %30 = vector.broadcast %cst_24 : f32 to vector<1x128xf32>
    %31 = arith.divf %29, %30 : vector<1x128xf32>
    %32 = vector.broadcast %31 : vector<1x128xf32> to vector<8x128xf32>
    %33 = arith.subf %27, %32 : vector<8x128xf32>
    %34 = arith.mulf %33, %33 : vector<8x128xf32>
    %cst_25 = arith.constant dense<0.000000e+00> : vector<128xf32>
    %35 = vector.multi_reduction <add>, %34, %cst_25 [0] : vector<8x128xf32> to vector<128xf32>
    %36 = vector.shape_cast %35 : vector<128xf32> to vector<1x128xf32>
    %cst_26 = arith.constant 8.000000e+00 : f32
    %37 = vector.broadcast %cst_26 : f32 to vector<1x128xf32>
    %38 = arith.divf %36, %37 : vector<1x128xf32>
    %cst_27 = arith.constant 9.99999974E-6 : f32
    %39 = vector.broadcast %cst_27 : f32 to vector<1x128xf32>
    %40 = arith.addf %38, %39 : vector<1x128xf32>
    %41 = math.rsqrt %40 : vector<1x128xf32>
    %42 = arith.mulf %16, %41 : vector<1x128xf32>
    %43 = vector.broadcast %42 : vector<1x128xf32> to vector<8x128xf32>
    %44 = arith.mulf %33, %43 : vector<8x128xf32>
    %45 = vector.broadcast %17 : vector<1x128xf32> to vector<8x128xf32>
    %46 = arith.addf %44, %45 : vector<8x128xf32>
    %cst_28 = arith.constant dense<0.000000e+00> : vector<8x128xf32>
    %47 = tpu.matmul %46, %6, %cst_28 {dimension_numbers = #tpu.dot_dimension_numbers<[1], [0], [0], [1], [0, 0, 1, 1], [], []>} : vector<8x128xf32>, vector<128x128xf32>, vector<8x128xf32> -> vector<8x128xf32>
    %48 = vector.broadcast %18 : vector<1x128xf32> to vector<8x128xf32>
    %49 = arith.addf %47, %48 : vector<8x128xf32>
    %cst_29 = arith.constant 0.000000e+00 : f32
    %50 = vector.broadcast %cst_29 : f32 to vector<8x128xf32>
    %51 = arith.maximumf %49, %50 : vector<8x128xf32>
    %cst_30 = arith.constant dense<0.000000e+00> : vector<128xf32>
    %52 = vector.multi_reduction <add>, %51, %cst_30 [0] : vector<8x128xf32> to vector<128xf32>
    %53 = vector.shape_cast %52 : vector<128xf32> to vector<1x128xf32>
    %cst_31 = arith.constant 8.000000e+00 : f32
    %54 = vector.broadcast %cst_31 : f32 to vector<1x128xf32>
    %55 = arith.divf %53, %54 : vector<1x128xf32>
    %56 = vector.broadcast %55 : vector<1x128xf32> to vector<8x128xf32>
    %57 = arith.subf %51, %56 : vector<8x128xf32>
    %58 = arith.mulf %57, %57 : vector<8x128xf32>
    %cst_32 = arith.constant dense<0.000000e+00> : vector<128xf32>
    %59 = vector.multi_reduction <add>, %58, %cst_32 [0] : vector<8x128xf32> to vector<128xf32>
    %60 = vector.shape_cast %59 : vector<128xf32> to vector<1x128xf32>
    %cst_33 = arith.constant 8.000000e+00 : f32
    %61 = vector.broadcast %cst_33 : f32 to vector<1x128xf32>
    %62 = arith.divf %60, %61 : vector<1x128xf32>
    %cst_34 = arith.constant 9.99999974E-6 : f32
    %63 = vector.broadcast %cst_34 : f32 to vector<1x128xf32>
    %64 = arith.addf %62, %63 : vector<1x128xf32>
    %65 = math.rsqrt %64 : vector<1x128xf32>
    %66 = arith.mulf %19, %65 : vector<1x128xf32>
    %67 = vector.broadcast %66 : vector<1x128xf32> to vector<8x128xf32>
    %68 = arith.mulf %57, %67 : vector<8x128xf32>
    %69 = vector.broadcast %20 : vector<1x128xf32> to vector<8x128xf32>
    %70 = arith.addf %68, %69 : vector<8x128xf32>
    %cst_35 = arith.constant dense<0.000000e+00> : vector<8x4xf32>
    %71 = tpu.matmul %70, %8, %cst_35 {dimension_numbers = #tpu.dot_dimension_numbers<[1], [0], [0], [1], [0, 0, 1, 1], [], []>} : vector<8x128xf32>, vector<128x4xf32>, vector<8x4xf32> -> vector<8x4xf32>
    %72 = vector.broadcast %21 : vector<1x4xf32> to vector<8x4xf32>
    %73 = arith.addf %71, %72 : vector<8x4xf32>
    %cst_36 = arith.constant dense<0.000000e+00> : vector<8x4xf32>
    %74 = tpu.matmul %70, %10, %cst_36 {dimension_numbers = #tpu.dot_dimension_numbers<[1], [0], [0], [1], [0, 0, 1, 1], [], []>} : vector<8x128xf32>, vector<128x4xf32>, vector<8x4xf32> -> vector<8x4xf32>
    %75 = vector.broadcast %22 : vector<1x4xf32> to vector<8x4xf32>
    %76 = arith.addf %74, %75 : vector<8x4xf32>
    %cst_37 = arith.constant 2.000000e+00 : f32
    %77 = vector.broadcast %cst_37 : f32 to vector<8x4xf32>
    %78 = arith.addf %73, %77 : vector<8x4xf32>
    %cst_38 = arith.constant 0.000000e+00 : f32
    %79 = vector.broadcast %cst_38 : f32 to vector<8x4xf32>
    %80 = arith.subf %79, %78 : vector<8x4xf32>
    %cst_39 = arith.constant 0.000000e+00 : f32
    %81 = vector.broadcast %cst_39 : f32 to vector<8x4xf32>
    %82 = arith.maximumf %80, %81 : vector<8x4xf32>
    %83 = math.absf %78 : vector<8x4xf32>
    %cst_40 = arith.constant 0.000000e+00 : f32
    %84 = vector.broadcast %cst_40 : f32 to vector<8x4xf32>
    %85 = arith.subf %84, %83 : vector<8x4xf32>
    %86 = math.exp %85 : vector<8x4xf32>
    %cst_41 = arith.constant 1.000000e+00 : f32
    %87 = vector.broadcast %cst_41 : f32 to vector<8x4xf32>
    %88 = arith.addf %87, %86 : vector<8x4xf32>
    %89 = math.log %88 : vector<8x4xf32>
    %90 = arith.addf %82, %89 : vector<8x4xf32>
    %cst_42 = arith.constant 0.000000e+00 : f32
    %91 = vector.broadcast %cst_42 : f32 to vector<8x4xf32>
    %92 = arith.subf %91, %90 : vector<8x4xf32>
    %93 = math.exp %92 : vector<8x4xf32>
    %94 = arith.mulf %93, %1 : vector<8x4xf32>
    %95 = arith.addf %94, %76 : vector<8x4xf32>
    %96 = arith.addf %2, %92 : vector<8x4xf32>
    %c1 = arith.constant 1 : index
    %c0_43 = arith.constant 0 : index
    %c0_44 = arith.constant 0 : index
    %97 = vector.load %arg3[%c1, %c0_43, %c0_44] : memref<4x4x128xf32, #tpu.memory_space<vmem>>, vector<1x4x128xf32>
    %98 = vector.shape_cast %97 : vector<1x4x128xf32> to vector<4x128xf32>
    %c1_45 = arith.constant 1 : index
    %c0_46 = arith.constant 0 : index
    %c0_47 = arith.constant 0 : index
    %99 = vector.load %arg4[%c1_45, %c0_46, %c0_47] : memref<4x128x128xf32, #tpu.memory_space<vmem>>, vector<1x128x128xf32>
    %100 = vector.shape_cast %99 : vector<1x128x128xf32> to vector<128x128xf32>
    %c1_48 = arith.constant 1 : index
    %c0_49 = arith.constant 0 : index
    %c0_50 = arith.constant 0 : index
    %101 = vector.load %arg5[%c1_48, %c0_49, %c0_50] : memref<4x128x4xf32, #tpu.memory_space<vmem>>, vector<1x128x4xf32>
    %102 = vector.shape_cast %101 : vector<1x128x4xf32> to vector<128x4xf32>
    %c1_51 = arith.constant 1 : index
    %c0_52 = arith.constant 0 : index
    %c0_53 = arith.constant 0 : index
    %103 = vector.load %arg6[%c1_51, %c0_52, %c0_53] : memref<4x128x4xf32, #tpu.memory_space<vmem>>, vector<1x128x4xf32>
    %104 = vector.shape_cast %103 : vector<1x128x4xf32> to vector<128x4xf32>
    %c1_54 = arith.constant 1 : index
    %c0_55 = arith.constant 0 : index
    %c0_56 = arith.constant 0 : index
    %105 = vector.load %arg7[%c1_54, %c0_55, %c0_56] : memref<4x8x128xf32, #tpu.memory_space<vmem>>, vector<1x8x128xf32>
    %106 = vector.shape_cast %105 : vector<1x8x128xf32> to vector<8x128xf32>
    %c1_57 = arith.constant 1 : index
    %c0_58 = arith.constant 0 : index
    %c0_59 = arith.constant 0 : index
    %107 = vector.load %arg8[%c1_57, %c0_58, %c0_59] : memref<4x2x4xf32, #tpu.memory_space<vmem>>, vector<1x2x4xf32>
    %108 = vector.shape_cast %107 : vector<1x2x4xf32> to vector<2x4xf32>
    %109 = vector.extract_strided_slice %106 {offsets = [0, 0], sizes = [1, 128], strides = [1, 1]} : vector<8x128xf32> to vector<1x128xf32>
    %110 = vector.extract_strided_slice %106 {offsets = [1, 0], sizes = [1, 128], strides = [1, 1]} : vector<8x128xf32> to vector<1x128xf32>
    %111 = vector.extract_strided_slice %106 {offsets = [2, 0], sizes = [1, 128], strides = [1, 1]} : vector<8x128xf32> to vector<1x128xf32>
    %112 = vector.extract_strided_slice %106 {offsets = [3, 0], sizes = [1, 128], strides = [1, 1]} : vector<8x128xf32> to vector<1x128xf32>
    %113 = vector.extract_strided_slice %106 {offsets = [4, 0], sizes = [1, 128], strides = [1, 1]} : vector<8x128xf32> to vector<1x128xf32>
    %114 = vector.extract_strided_slice %106 {offsets = [5, 0], sizes = [1, 128], strides = [1, 1]} : vector<8x128xf32> to vector<1x128xf32>
    %115 = vector.extract_strided_slice %108 {offsets = [0, 0], sizes = [1, 4], strides = [1, 1]} : vector<2x4xf32> to vector<1x4xf32>
    %116 = vector.extract_strided_slice %108 {offsets = [1, 0], sizes = [1, 4], strides = [1, 1]} : vector<2x4xf32> to vector<1x4xf32>
    %cst_60 = arith.constant dense<0.000000e+00> : vector<8x128xf32>
    %117 = tpu.matmul %0, %98, %cst_60 {dimension_numbers = #tpu.dot_dimension_numbers<[1], [0], [0], [1], [0, 0, 1, 1], [], []>} : vector<8x4xf32>, vector<4x128xf32>, vector<8x128xf32> -> vector<8x128xf32>
    %118 = vector.broadcast %109 : vector<1x128xf32> to vector<8x128xf32>
    %119 = arith.addf %117, %118 : vector<8x128xf32>
    %cst_61 = arith.constant 0.000000e+00 : f32
    %120 = vector.broadcast %cst_61 : f32 to vector<8x128xf32>
    %121 = arith.maximumf %119, %120 : vector<8x128xf32>
    %cst_62 = arith.constant dense<0.000000e+00> : vector<128xf32>
    %122 = vector.multi_reduction <add>, %121, %cst_62 [0] : vector<8x128xf32> to vector<128xf32>
    %123 = vector.shape_cast %122 : vector<128xf32> to vector<1x128xf32>
    %cst_63 = arith.constant 8.000000e+00 : f32
    %124 = vector.broadcast %cst_63 : f32 to vector<1x128xf32>
    %125 = arith.divf %123, %124 : vector<1x128xf32>
    %126 = vector.broadcast %125 : vector<1x128xf32> to vector<8x128xf32>
    %127 = arith.subf %121, %126 : vector<8x128xf32>
    %128 = arith.mulf %127, %127 : vector<8x128xf32>
    %cst_64 = arith.constant dense<0.000000e+00> : vector<128xf32>
    %129 = vector.multi_reduction <add>, %128, %cst_64 [0] : vector<8x128xf32> to vector<128xf32>
    %130 = vector.shape_cast %129 : vector<128xf32> to vector<1x128xf32>
    %cst_65 = arith.constant 8.000000e+00 : f32
    %131 = vector.broadcast %cst_65 : f32 to vector<1x128xf32>
    %132 = arith.divf %130, %131 : vector<1x128xf32>
    %cst_66 = arith.constant 9.99999974E-6 : f32
    %133 = vector.broadcast %cst_66 : f32 to vector<1x128xf32>
    %134 = arith.addf %132, %133 : vector<1x128xf32>
    %135 = math.rsqrt %134 : vector<1x128xf32>
    %136 = arith.mulf %110, %135 : vector<1x128xf32>
    %137 = vector.broadcast %136 : vector<1x128xf32> to vector<8x128xf32>
    %138 = arith.mulf %127, %137 : vector<8x128xf32>
    %139 = vector.broadcast %111 : vector<1x128xf32> to vector<8x128xf32>
    %140 = arith.addf %138, %139 : vector<8x128xf32>
    %cst_67 = arith.constant dense<0.000000e+00> : vector<8x128xf32>
    %141 = tpu.matmul %140, %100, %cst_67 {dimension_numbers = #tpu.dot_dimension_numbers<[1], [0], [0], [1], [0, 0, 1, 1], [], []>} : vector<8x128xf32>, vector<128x128xf32>, vector<8x128xf32> -> vector<8x128xf32>
    %142 = vector.broadcast %112 : vector<1x128xf32> to vector<8x128xf32>
    %143 = arith.addf %141, %142 : vector<8x128xf32>
    %cst_68 = arith.constant 0.000000e+00 : f32
    %144 = vector.broadcast %cst_68 : f32 to vector<8x128xf32>
    %145 = arith.maximumf %143, %144 : vector<8x128xf32>
    %cst_69 = arith.constant dense<0.000000e+00> : vector<128xf32>
    %146 = vector.multi_reduction <add>, %145, %cst_69 [0] : vector<8x128xf32> to vector<128xf32>
    %147 = vector.shape_cast %146 : vector<128xf32> to vector<1x128xf32>
    %cst_70 = arith.constant 8.000000e+00 : f32
    %148 = vector.broadcast %cst_70 : f32 to vector<1x128xf32>
    %149 = arith.divf %147, %148 : vector<1x128xf32>
    %150 = vector.broadcast %149 : vector<1x128xf32> to vector<8x128xf32>
    %151 = arith.subf %145, %150 : vector<8x128xf32>
    %152 = arith.mulf %151, %151 : vector<8x128xf32>
    %cst_71 = arith.constant dense<0.000000e+00> : vector<128xf32>
    %153 = vector.multi_reduction <add>, %152, %cst_71 [0] : vector<8x128xf32> to vector<128xf32>
    %154 = vector.shape_cast %153 : vector<128xf32> to vector<1x128xf32>
    %cst_72 = arith.constant 8.000000e+00 : f32
    %155 = vector.broadcast %cst_72 : f32 to vector<1x128xf32>
    %156 = arith.divf %154, %155 : vector<1x128xf32>
    %cst_73 = arith.constant 9.99999974E-6 : f32
    %157 = vector.broadcast %cst_73 : f32 to vector<1x128xf32>
    %158 = arith.addf %156, %157 : vector<1x128xf32>
    %159 = math.rsqrt %158 : vector<1x128xf32>
    %160 = arith.mulf %113, %159 : vector<1x128xf32>
    %161 = vector.broadcast %160 : vector<1x128xf32> to vector<8x128xf32>
    %162 = arith.mulf %151, %161 : vector<8x128xf32>
    %163 = vector.broadcast %114 : vector<1x128xf32> to vector<8x128xf32>
    %164 = arith.addf %162, %163 : vector<8x128xf32>
    %cst_74 = arith.constant dense<0.000000e+00> : vector<8x4xf32>
    %165 = tpu.matmul %164, %102, %cst_74 {dimension_numbers = #tpu.dot_dimension_numbers<[1], [0], [0], [1], [0, 0, 1, 1], [], []>} : vector<8x128xf32>, vector<128x4xf32>, vector<8x4xf32> -> vector<8x4xf32>
    %166 = vector.broadcast %115 : vector<1x4xf32> to vector<8x4xf32>
    %167 = arith.addf %165, %166 : vector<8x4xf32>
    %cst_75 = arith.constant dense<0.000000e+00> : vector<8x4xf32>
    %168 = tpu.matmul %164, %104, %cst_75 {dimension_numbers = #tpu.dot_dimension_numbers<[1], [0], [0], [1], [0, 0, 1, 1], [], []>} : vector<8x128xf32>, vector<128x4xf32>, vector<8x4xf32> -> vector<8x4xf32>
    %169 = vector.broadcast %116 : vector<1x4xf32> to vector<8x4xf32>
    %170 = arith.addf %168, %169 : vector<8x4xf32>
    %cst_76 = arith.constant 2.000000e+00 : f32
    %171 = vector.broadcast %cst_76 : f32 to vector<8x4xf32>
    %172 = arith.addf %167, %171 : vector<8x4xf32>
    %cst_77 = arith.constant 0.000000e+00 : f32
    %173 = vector.broadcast %cst_77 : f32 to vector<8x4xf32>
    %174 = arith.subf %173, %172 : vector<8x4xf32>
    %cst_78 = arith.constant 0.000000e+00 : f32
    %175 = vector.broadcast %cst_78 : f32 to vector<8x4xf32>
    %176 = arith.maximumf %174, %175 : vector<8x4xf32>
    %177 = math.absf %172 : vector<8x4xf32>
    %cst_79 = arith.constant 0.000000e+00 : f32
    %178 = vector.broadcast %cst_79 : f32 to vector<8x4xf32>
    %179 = arith.subf %178, %177 : vector<8x4xf32>
    %180 = math.exp %179 : vector<8x4xf32>
    %cst_80 = arith.constant 1.000000e+00 : f32
    %181 = vector.broadcast %cst_80 : f32 to vector<8x4xf32>
    %182 = arith.addf %181, %180 : vector<8x4xf32>
    %183 = math.log %182 : vector<8x4xf32>
    %184 = arith.addf %176, %183 : vector<8x4xf32>
    %cst_81 = arith.constant 0.000000e+00 : f32
    %185 = vector.broadcast %cst_81 : f32 to vector<8x4xf32>
    %186 = arith.subf %185, %184 : vector<8x4xf32>
    %187 = math.exp %186 : vector<8x4xf32>
    %188 = arith.mulf %187, %95 : vector<8x4xf32>
    %189 = arith.addf %188, %170 : vector<8x4xf32>
    %190 = arith.addf %96, %186 : vector<8x4xf32>
    %c2 = arith.constant 2 : index
    %c0_82 = arith.constant 0 : index
    %c0_83 = arith.constant 0 : index
    %191 = vector.load %arg3[%c2, %c0_82, %c0_83] : memref<4x4x128xf32, #tpu.memory_space<vmem>>, vector<1x4x128xf32>
    %192 = vector.shape_cast %191 : vector<1x4x128xf32> to vector<4x128xf32>
    %c2_84 = arith.constant 2 : index
    %c0_85 = arith.constant 0 : index
    %c0_86 = arith.constant 0 : index
    %193 = vector.load %arg4[%c2_84, %c0_85, %c0_86] : memref<4x128x128xf32, #tpu.memory_space<vmem>>, vector<1x128x128xf32>
    %194 = vector.shape_cast %193 : vector<1x128x128xf32> to vector<128x128xf32>
    %c2_87 = arith.constant 2 : index
    %c0_88 = arith.constant 0 : index
    %c0_89 = arith.constant 0 : index
    %195 = vector.load %arg5[%c2_87, %c0_88, %c0_89] : memref<4x128x4xf32, #tpu.memory_space<vmem>>, vector<1x128x4xf32>
    %196 = vector.shape_cast %195 : vector<1x128x4xf32> to vector<128x4xf32>
    %c2_90 = arith.constant 2 : index
    %c0_91 = arith.constant 0 : index
    %c0_92 = arith.constant 0 : index
    %197 = vector.load %arg6[%c2_90, %c0_91, %c0_92] : memref<4x128x4xf32, #tpu.memory_space<vmem>>, vector<1x128x4xf32>
    %198 = vector.shape_cast %197 : vector<1x128x4xf32> to vector<128x4xf32>
    %c2_93 = arith.constant 2 : index
    %c0_94 = arith.constant 0 : index
    %c0_95 = arith.constant 0 : index
    %199 = vector.load %arg7[%c2_93, %c0_94, %c0_95] : memref<4x8x128xf32, #tpu.memory_space<vmem>>, vector<1x8x128xf32>
    %200 = vector.shape_cast %199 : vector<1x8x128xf32> to vector<8x128xf32>
    %c2_96 = arith.constant 2 : index
    %c0_97 = arith.constant 0 : index
    %c0_98 = arith.constant 0 : index
    %201 = vector.load %arg8[%c2_96, %c0_97, %c0_98] : memref<4x2x4xf32, #tpu.memory_space<vmem>>, vector<1x2x4xf32>
    %202 = vector.shape_cast %201 : vector<1x2x4xf32> to vector<2x4xf32>
    %203 = vector.extract_strided_slice %200 {offsets = [0, 0], sizes = [1, 128], strides = [1, 1]} : vector<8x128xf32> to vector<1x128xf32>
    %204 = vector.extract_strided_slice %200 {offsets = [1, 0], sizes = [1, 128], strides = [1, 1]} : vector<8x128xf32> to vector<1x128xf32>
    %205 = vector.extract_strided_slice %200 {offsets = [2, 0], sizes = [1, 128], strides = [1, 1]} : vector<8x128xf32> to vector<1x128xf32>
    %206 = vector.extract_strided_slice %200 {offsets = [3, 0], sizes = [1, 128], strides = [1, 1]} : vector<8x128xf32> to vector<1x128xf32>
    %207 = vector.extract_strided_slice %200 {offsets = [4, 0], sizes = [1, 128], strides = [1, 1]} : vector<8x128xf32> to vector<1x128xf32>
    %208 = vector.extract_strided_slice %200 {offsets = [5, 0], sizes = [1, 128], strides = [1, 1]} : vector<8x128xf32> to vector<1x128xf32>
    %209 = vector.extract_strided_slice %202 {offsets = [0, 0], sizes = [1, 4], strides = [1, 1]} : vector<2x4xf32> to vector<1x4xf32>
    %210 = vector.extract_strided_slice %202 {offsets = [1, 0], sizes = [1, 4], strides = [1, 1]} : vector<2x4xf32> to vector<1x4xf32>
    %cst_99 = arith.constant dense<0.000000e+00> : vector<8x128xf32>
    %211 = tpu.matmul %0, %192, %cst_99 {dimension_numbers = #tpu.dot_dimension_numbers<[1], [0], [0], [1], [0, 0, 1, 1], [], []>} : vector<8x4xf32>, vector<4x128xf32>, vector<8x128xf32> -> vector<8x128xf32>
    %212 = vector.broadcast %203 : vector<1x128xf32> to vector<8x128xf32>
    %213 = arith.addf %211, %212 : vector<8x128xf32>
    %cst_100 = arith.constant 0.000000e+00 : f32
    %214 = vector.broadcast %cst_100 : f32 to vector<8x128xf32>
    %215 = arith.maximumf %213, %214 : vector<8x128xf32>
    %cst_101 = arith.constant dense<0.000000e+00> : vector<128xf32>
    %216 = vector.multi_reduction <add>, %215, %cst_101 [0] : vector<8x128xf32> to vector<128xf32>
    %217 = vector.shape_cast %216 : vector<128xf32> to vector<1x128xf32>
    %cst_102 = arith.constant 8.000000e+00 : f32
    %218 = vector.broadcast %cst_102 : f32 to vector<1x128xf32>
    %219 = arith.divf %217, %218 : vector<1x128xf32>
    %220 = vector.broadcast %219 : vector<1x128xf32> to vector<8x128xf32>
    %221 = arith.subf %215, %220 : vector<8x128xf32>
    %222 = arith.mulf %221, %221 : vector<8x128xf32>
    %cst_103 = arith.constant dense<0.000000e+00> : vector<128xf32>
    %223 = vector.multi_reduction <add>, %222, %cst_103 [0] : vector<8x128xf32> to vector<128xf32>
    %224 = vector.shape_cast %223 : vector<128xf32> to vector<1x128xf32>
    %cst_104 = arith.constant 8.000000e+00 : f32
    %225 = vector.broadcast %cst_104 : f32 to vector<1x128xf32>
    %226 = arith.divf %224, %225 : vector<1x128xf32>
    %cst_105 = arith.constant 9.99999974E-6 : f32
    %227 = vector.broadcast %cst_105 : f32 to vector<1x128xf32>
    %228 = arith.addf %226, %227 : vector<1x128xf32>
    %229 = math.rsqrt %228 : vector<1x128xf32>
    %230 = arith.mulf %204, %229 : vector<1x128xf32>
    %231 = vector.broadcast %230 : vector<1x128xf32> to vector<8x128xf32>
    %232 = arith.mulf %221, %231 : vector<8x128xf32>
    %233 = vector.broadcast %205 : vector<1x128xf32> to vector<8x128xf32>
    %234 = arith.addf %232, %233 : vector<8x128xf32>
    %cst_106 = arith.constant dense<0.000000e+00> : vector<8x128xf32>
    %235 = tpu.matmul %234, %194, %cst_106 {dimension_numbers = #tpu.dot_dimension_numbers<[1], [0], [0], [1], [0, 0, 1, 1], [], []>} : vector<8x128xf32>, vector<128x128xf32>, vector<8x128xf32> -> vector<8x128xf32>
    %236 = vector.broadcast %206 : vector<1x128xf32> to vector<8x128xf32>
    %237 = arith.addf %235, %236 : vector<8x128xf32>
    %cst_107 = arith.constant 0.000000e+00 : f32
    %238 = vector.broadcast %cst_107 : f32 to vector<8x128xf32>
    %239 = arith.maximumf %237, %238 : vector<8x128xf32>
    %cst_108 = arith.constant dense<0.000000e+00> : vector<128xf32>
    %240 = vector.multi_reduction <add>, %239, %cst_108 [0] : vector<8x128xf32> to vector<128xf32>
    %241 = vector.shape_cast %240 : vector<128xf32> to vector<1x128xf32>
    %cst_109 = arith.constant 8.000000e+00 : f32
    %242 = vector.broadcast %cst_109 : f32 to vector<1x128xf32>
    %243 = arith.divf %241, %242 : vector<1x128xf32>
    %244 = vector.broadcast %243 : vector<1x128xf32> to vector<8x128xf32>
    %245 = arith.subf %239, %244 : vector<8x128xf32>
    %246 = arith.mulf %245, %245 : vector<8x128xf32>
    %cst_110 = arith.constant dense<0.000000e+00> : vector<128xf32>
    %247 = vector.multi_reduction <add>, %246, %cst_110 [0] : vector<8x128xf32> to vector<128xf32>
    %248 = vector.shape_cast %247 : vector<128xf32> to vector<1x128xf32>
    %cst_111 = arith.constant 8.000000e+00 : f32
    %249 = vector.broadcast %cst_111 : f32 to vector<1x128xf32>
    %250 = arith.divf %248, %249 : vector<1x128xf32>
    %cst_112 = arith.constant 9.99999974E-6 : f32
    %251 = vector.broadcast %cst_112 : f32 to vector<1x128xf32>
    %252 = arith.addf %250, %251 : vector<1x128xf32>
    %253 = math.rsqrt %252 : vector<1x128xf32>
    %254 = arith.mulf %207, %253 : vector<1x128xf32>
    %255 = vector.broadcast %254 : vector<1x128xf32> to vector<8x128xf32>
    %256 = arith.mulf %245, %255 : vector<8x128xf32>
    %257 = vector.broadcast %208 : vector<1x128xf32> to vector<8x128xf32>
    %258 = arith.addf %256, %257 : vector<8x128xf32>
    %cst_113 = arith.constant dense<0.000000e+00> : vector<8x4xf32>
    %259 = tpu.matmul %258, %196, %cst_113 {dimension_numbers = #tpu.dot_dimension_numbers<[1], [0], [0], [1], [0, 0, 1, 1], [], []>} : vector<8x128xf32>, vector<128x4xf32>, vector<8x4xf32> -> vector<8x4xf32>
    %260 = vector.broadcast %209 : vector<1x4xf32> to vector<8x4xf32>
    %261 = arith.addf %259, %260 : vector<8x4xf32>
    %cst_114 = arith.constant dense<0.000000e+00> : vector<8x4xf32>
    %262 = tpu.matmul %258, %198, %cst_114 {dimension_numbers = #tpu.dot_dimension_numbers<[1], [0], [0], [1], [0, 0, 1, 1], [], []>} : vector<8x128xf32>, vector<128x4xf32>, vector<8x4xf32> -> vector<8x4xf32>
    %263 = vector.broadcast %210 : vector<1x4xf32> to vector<8x4xf32>
    %264 = arith.addf %262, %263 : vector<8x4xf32>
    %cst_115 = arith.constant 2.000000e+00 : f32
    %265 = vector.broadcast %cst_115 : f32 to vector<8x4xf32>
    %266 = arith.addf %261, %265 : vector<8x4xf32>
    %cst_116 = arith.constant 0.000000e+00 : f32
    %267 = vector.broadcast %cst_116 : f32 to vector<8x4xf32>
    %268 = arith.subf %267, %266 : vector<8x4xf32>
    %cst_117 = arith.constant 0.000000e+00 : f32
    %269 = vector.broadcast %cst_117 : f32 to vector<8x4xf32>
    %270 = arith.maximumf %268, %269 : vector<8x4xf32>
    %271 = math.absf %266 : vector<8x4xf32>
    %cst_118 = arith.constant 0.000000e+00 : f32
    %272 = vector.broadcast %cst_118 : f32 to vector<8x4xf32>
    %273 = arith.subf %272, %271 : vector<8x4xf32>
    %274 = math.exp %273 : vector<8x4xf32>
    %cst_119 = arith.constant 1.000000e+00 : f32
    %275 = vector.broadcast %cst_119 : f32 to vector<8x4xf32>
    %276 = arith.addf %275, %274 : vector<8x4xf32>
    %277 = math.log %276 : vector<8x4xf32>
    %278 = arith.addf %270, %277 : vector<8x4xf32>
    %cst_120 = arith.constant 0.000000e+00 : f32
    %279 = vector.broadcast %cst_120 : f32 to vector<8x4xf32>
    %280 = arith.subf %279, %278 : vector<8x4xf32>
    %281 = math.exp %280 : vector<8x4xf32>
    %282 = arith.mulf %281, %189 : vector<8x4xf32>
    %283 = arith.addf %282, %264 : vector<8x4xf32>
    %284 = arith.addf %190, %280 : vector<8x4xf32>
    %c3 = arith.constant 3 : index
    %c0_121 = arith.constant 0 : index
    %c0_122 = arith.constant 0 : index
    %285 = vector.load %arg3[%c3, %c0_121, %c0_122] : memref<4x4x128xf32, #tpu.memory_space<vmem>>, vector<1x4x128xf32>
    %286 = vector.shape_cast %285 : vector<1x4x128xf32> to vector<4x128xf32>
    %c3_123 = arith.constant 3 : index
    %c0_124 = arith.constant 0 : index
    %c0_125 = arith.constant 0 : index
    %287 = vector.load %arg4[%c3_123, %c0_124, %c0_125] : memref<4x128x128xf32, #tpu.memory_space<vmem>>, vector<1x128x128xf32>
    %288 = vector.shape_cast %287 : vector<1x128x128xf32> to vector<128x128xf32>
    %c3_126 = arith.constant 3 : index
    %c0_127 = arith.constant 0 : index
    %c0_128 = arith.constant 0 : index
    %289 = vector.load %arg5[%c3_126, %c0_127, %c0_128] : memref<4x128x4xf32, #tpu.memory_space<vmem>>, vector<1x128x4xf32>
    %290 = vector.shape_cast %289 : vector<1x128x4xf32> to vector<128x4xf32>
    %c3_129 = arith.constant 3 : index
    %c0_130 = arith.constant 0 : index
    %c0_131 = arith.constant 0 : index
    %291 = vector.load %arg6[%c3_129, %c0_130, %c0_131] : memref<4x128x4xf32, #tpu.memory_space<vmem>>, vector<1x128x4xf32>
    %292 = vector.shape_cast %291 : vector<1x128x4xf32> to vector<128x4xf32>
    %c3_132 = arith.constant 3 : index
    %c0_133 = arith.constant 0 : index
    %c0_134 = arith.constant 0 : index
    %293 = vector.load %arg7[%c3_132, %c0_133, %c0_134] : memref<4x8x128xf32, #tpu.memory_space<vmem>>, vector<1x8x128xf32>
    %294 = vector.shape_cast %293 : vector<1x8x128xf32> to vector<8x128xf32>
    %c3_135 = arith.constant 3 : index
    %c0_136 = arith.constant 0 : index
    %c0_137 = arith.constant 0 : index
    %295 = vector.load %arg8[%c3_135, %c0_136, %c0_137] : memref<4x2x4xf32, #tpu.memory_space<vmem>>, vector<1x2x4xf32>
    %296 = vector.shape_cast %295 : vector<1x2x4xf32> to vector<2x4xf32>
    %297 = vector.extract_strided_slice %294 {offsets = [0, 0], sizes = [1, 128], strides = [1, 1]} : vector<8x128xf32> to vector<1x128xf32>
    %298 = vector.extract_strided_slice %294 {offsets = [1, 0], sizes = [1, 128], strides = [1, 1]} : vector<8x128xf32> to vector<1x128xf32>
    %299 = vector.extract_strided_slice %294 {offsets = [2, 0], sizes = [1, 128], strides = [1, 1]} : vector<8x128xf32> to vector<1x128xf32>
    %300 = vector.extract_strided_slice %294 {offsets = [3, 0], sizes = [1, 128], strides = [1, 1]} : vector<8x128xf32> to vector<1x128xf32>
    %301 = vector.extract_strided_slice %294 {offsets = [4, 0], sizes = [1, 128], strides = [1, 1]} : vector<8x128xf32> to vector<1x128xf32>
    %302 = vector.extract_strided_slice %294 {offsets = [5, 0], sizes = [1, 128], strides = [1, 1]} : vector<8x128xf32> to vector<1x128xf32>
    %303 = vector.extract_strided_slice %296 {offsets = [0, 0], sizes = [1, 4], strides = [1, 1]} : vector<2x4xf32> to vector<1x4xf32>
    %304 = vector.extract_strided_slice %296 {offsets = [1, 0], sizes = [1, 4], strides = [1, 1]} : vector<2x4xf32> to vector<1x4xf32>
    %cst_138 = arith.constant dense<0.000000e+00> : vector<8x128xf32>
    %305 = tpu.matmul %0, %286, %cst_138 {dimension_numbers = #tpu.dot_dimension_numbers<[1], [0], [0], [1], [0, 0, 1, 1], [], []>} : vector<8x4xf32>, vector<4x128xf32>, vector<8x128xf32> -> vector<8x128xf32>
    %306 = vector.broadcast %297 : vector<1x128xf32> to vector<8x128xf32>
    %307 = arith.addf %305, %306 : vector<8x128xf32>
    %cst_139 = arith.constant 0.000000e+00 : f32
    %308 = vector.broadcast %cst_139 : f32 to vector<8x128xf32>
    %309 = arith.maximumf %307, %308 : vector<8x128xf32>
    %cst_140 = arith.constant dense<0.000000e+00> : vector<128xf32>
    %310 = vector.multi_reduction <add>, %309, %cst_140 [0] : vector<8x128xf32> to vector<128xf32>
    %311 = vector.shape_cast %310 : vector<128xf32> to vector<1x128xf32>
    %cst_141 = arith.constant 8.000000e+00 : f32
    %312 = vector.broadcast %cst_141 : f32 to vector<1x128xf32>
    %313 = arith.divf %311, %312 : vector<1x128xf32>
    %314 = vector.broadcast %313 : vector<1x128xf32> to vector<8x128xf32>
    %315 = arith.subf %309, %314 : vector<8x128xf32>
    %316 = arith.mulf %315, %315 : vector<8x128xf32>
    %cst_142 = arith.constant dense<0.000000e+00> : vector<128xf32>
    %317 = vector.multi_reduction <add>, %316, %cst_142 [0] : vector<8x128xf32> to vector<128xf32>
    %318 = vector.shape_cast %317 : vector<128xf32> to vector<1x128xf32>
    %cst_143 = arith.constant 8.000000e+00 : f32
    %319 = vector.broadcast %cst_143 : f32 to vector<1x128xf32>
    %320 = arith.divf %318, %319 : vector<1x128xf32>
    %cst_144 = arith.constant 9.99999974E-6 : f32
    %321 = vector.broadcast %cst_144 : f32 to vector<1x128xf32>
    %322 = arith.addf %320, %321 : vector<1x128xf32>
    %323 = math.rsqrt %322 : vector<1x128xf32>
    %324 = arith.mulf %298, %323 : vector<1x128xf32>
    %325 = vector.broadcast %324 : vector<1x128xf32> to vector<8x128xf32>
    %326 = arith.mulf %315, %325 : vector<8x128xf32>
    %327 = vector.broadcast %299 : vector<1x128xf32> to vector<8x128xf32>
    %328 = arith.addf %326, %327 : vector<8x128xf32>
    %cst_145 = arith.constant dense<0.000000e+00> : vector<8x128xf32>
    %329 = tpu.matmul %328, %288, %cst_145 {dimension_numbers = #tpu.dot_dimension_numbers<[1], [0], [0], [1], [0, 0, 1, 1], [], []>} : vector<8x128xf32>, vector<128x128xf32>, vector<8x128xf32> -> vector<8x128xf32>
    %330 = vector.broadcast %300 : vector<1x128xf32> to vector<8x128xf32>
    %331 = arith.addf %329, %330 : vector<8x128xf32>
    %cst_146 = arith.constant 0.000000e+00 : f32
    %332 = vector.broadcast %cst_146 : f32 to vector<8x128xf32>
    %333 = arith.maximumf %331, %332 : vector<8x128xf32>
    %cst_147 = arith.constant dense<0.000000e+00> : vector<128xf32>
    %334 = vector.multi_reduction <add>, %333, %cst_147 [0] : vector<8x128xf32> to vector<128xf32>
    %335 = vector.shape_cast %334 : vector<128xf32> to vector<1x128xf32>
    %cst_148 = arith.constant 8.000000e+00 : f32
    %336 = vector.broadcast %cst_148 : f32 to vector<1x128xf32>
    %337 = arith.divf %335, %336 : vector<1x128xf32>
    %338 = vector.broadcast %337 : vector<1x128xf32> to vector<8x128xf32>
    %339 = arith.subf %333, %338 : vector<8x128xf32>
    %340 = arith.mulf %339, %339 : vector<8x128xf32>
    %cst_149 = arith.constant dense<0.000000e+00> : vector<128xf32>
    %341 = vector.multi_reduction <add>, %340, %cst_149 [0] : vector<8x128xf32> to vector<128xf32>
    %342 = vector.shape_cast %341 : vector<128xf32> to vector<1x128xf32>
    %cst_150 = arith.constant 8.000000e+00 : f32
    %343 = vector.broadcast %cst_150 : f32 to vector<1x128xf32>
    %344 = arith.divf %342, %343 : vector<1x128xf32>
    %cst_151 = arith.constant 9.99999974E-6 : f32
    %345 = vector.broadcast %cst_151 : f32 to vector<1x128xf32>
    %346 = arith.addf %344, %345 : vector<1x128xf32>
    %347 = math.rsqrt %346 : vector<1x128xf32>
    %348 = arith.mulf %301, %347 : vector<1x128xf32>
    %349 = vector.broadcast %348 : vector<1x128xf32> to vector<8x128xf32>
    %350 = arith.mulf %339, %349 : vector<8x128xf32>
    %351 = vector.broadcast %302 : vector<1x128xf32> to vector<8x128xf32>
    %352 = arith.addf %350, %351 : vector<8x128xf32>
    %cst_152 = arith.constant dense<0.000000e+00> : vector<8x4xf32>
    %353 = tpu.matmul %352, %290, %cst_152 {dimension_numbers = #tpu.dot_dimension_numbers<[1], [0], [0], [1], [0, 0, 1, 1], [], []>} : vector<8x128xf32>, vector<128x4xf32>, vector<8x4xf32> -> vector<8x4xf32>
    %354 = vector.broadcast %303 : vector<1x4xf32> to vector<8x4xf32>
    %355 = arith.addf %353, %354 : vector<8x4xf32>
    %cst_153 = arith.constant dense<0.000000e+00> : vector<8x4xf32>
    %356 = tpu.matmul %352, %292, %cst_153 {dimension_numbers = #tpu.dot_dimension_numbers<[1], [0], [0], [1], [0, 0, 1, 1], [], []>} : vector<8x128xf32>, vector<128x4xf32>, vector<8x4xf32> -> vector<8x4xf32>
    %357 = vector.broadcast %304 : vector<1x4xf32> to vector<8x4xf32>
    %358 = arith.addf %356, %357 : vector<8x4xf32>
    %cst_154 = arith.constant 2.000000e+00 : f32
    %359 = vector.broadcast %cst_154 : f32 to vector<8x4xf32>
    %360 = arith.addf %355, %359 : vector<8x4xf32>
    %cst_155 = arith.constant 0.000000e+00 : f32
    %361 = vector.broadcast %cst_155 : f32 to vector<8x4xf32>
    %362 = arith.subf %361, %360 : vector<8x4xf32>
    %cst_156 = arith.constant 0.000000e+00 : f32
    %363 = vector.broadcast %cst_156 : f32 to vector<8x4xf32>
    %364 = arith.maximumf %362, %363 : vector<8x4xf32>
    %365 = math.absf %360 : vector<8x4xf32>
    %cst_157 = arith.constant 0.000000e+00 : f32
    %366 = vector.broadcast %cst_157 : f32 to vector<8x4xf32>
    %367 = arith.subf %366, %365 : vector<8x4xf32>
    %368 = math.exp %367 : vector<8x4xf32>
    %cst_158 = arith.constant 1.000000e+00 : f32
    %369 = vector.broadcast %cst_158 : f32 to vector<8x4xf32>
    %370 = arith.addf %369, %368 : vector<8x4xf32>
    %371 = math.log %370 : vector<8x4xf32>
    %372 = arith.addf %364, %371 : vector<8x4xf32>
    %cst_159 = arith.constant 0.000000e+00 : f32
    %373 = vector.broadcast %cst_159 : f32 to vector<8x4xf32>
    %374 = arith.subf %373, %372 : vector<8x4xf32>
    %375 = math.exp %374 : vector<8x4xf32>
    %376 = arith.mulf %375, %283 : vector<8x4xf32>
    %377 = arith.addf %376, %358 : vector<8x4xf32>
    %378 = arith.addf %284, %374 : vector<8x4xf32>
    %c0_160 = arith.constant 0 : index
    %c0_161 = arith.constant 0 : index
    %379 = vector.load %arg9[%c0_160, %c0_161] : memref<8x4xf32, #tpu.memory_space<vmem>>, vector<8x4xf32>
    tpu.vector_store %arg9[%c0_160, %c0_161], %377 {strides = array<i32>} : memref<8x4xf32, #tpu.memory_space<vmem>>, vector<8x4xf32>,
    %cst_162 = arith.constant dense<0.000000e+00> : vector<8xf32>
    %380 = vector.multi_reduction <add>, %378, %cst_162 [1] : vector<8x4xf32> to vector<8xf32>
    %381 = vector.shape_cast %380 : vector<8xf32> to vector<8x1xf32>
    %c0_163 = arith.constant 0 : index
    %c0_164 = arith.constant 0 : index
    %382 = vector.load %arg10[%c0_163, %c0_164] : memref<8x1xf32, #tpu.memory_space<vmem>>, vector<8x1xf32>
    tpu.vector_store %arg10[%c0_163, %c0_164], %381 {strides = array<i32>} : memref<8x1xf32, #tpu.memory_space<vmem>>, vector<8x1xf32>,
    return
  }
  func.func @transform_0(%arg0: i32) -> (i32, i32) {
    %c0_i32 = arith.constant 0 : i32
    %c0_i32_0 = arith.constant 0 : i32
    %c0_i32_1 = arith.constant 0 : i32
    return %c0_i32, %c0_i32_0 : i32, i32
  }
  func.func @transform_1(%arg0: i32) -> (i32, i32) {
    %c0_i32 = arith.constant 0 : i32
    %c0_i32_0 = arith.constant 0 : i32
    %c0_i32_1 = arith.constant 0 : i32
    return %c0_i32, %c0_i32_0 : i32, i32
  }
  func.func @transform_2(%arg0: i32) -> (i32, i32, i32) {
    %c0_i32 = arith.constant 0 : i32
    %c0_i32_0 = arith.constant 0 : i32
    %c0_i32_1 = arith.constant 0 : i32
    %c0_i32_2 = arith.constant 0 : i32
    return %c0_i32, %c0_i32_0, %c0_i32_1 : i32, i32, i32
  }
  func.func @transform_3(%arg0: i32) -> (i32, i32, i32) {
    %c0_i32 = arith.constant 0 : i32
    %c0_i32_0 = arith.constant 0 : i32
    %c0_i32_1 = arith.constant 0 : i32
    %c0_i32_2 = arith.constant 0 : i32
    return %c0_i32, %c0_i32_0, %c0_i32_1 : i32, i32, i32
  }
  func.func @transform_4(%arg0: i32) -> (i32, i32, i32) {
    %c0_i32 = arith.constant 0 : i32
    %c0_i32_0 = arith.constant 0 : i32
    %c0_i32_1 = arith.constant 0 : i32
    %c0_i32_2 = arith.constant 0 : i32
    return %c0_i32, %c0_i32_0, %c0_i32_1 : i32, i32, i32
  }
  func.func @transform_5(%arg0: i32) -> (i32, i32, i32) {
    %c0_i32 = arith.constant 0 : i32
    %c0_i32_0 = arith.constant 0 : i32
    %c0_i32_1 = arith.constant 0 : i32
    %c0_i32_2 = arith.constant 0 : i32
    return %c0_i32, %c0_i32_0, %c0_i32_1 : i32, i32, i32
  }
  func.func @transform_6(%arg0: i32) -> (i32, i32, i32) {
    %c0_i32 = arith.constant 0 : i32
    %c0_i32_0 = arith.constant 0 : i32
    %c0_i32_1 = arith.constant 0 : i32
    %c0_i32_2 = arith.constant 0 : i32
    return %c0_i32, %c0_i32_0, %c0_i32_1 : i32, i32, i32
  }
  func.func @transform_7(%arg0: i32) -> (i32, i32, i32) {
    %c0_i32 = arith.constant 0 : i32
    %c0_i32_0 = arith.constant 0 : i32
    %c0_i32_1 = arith.constant 0 : i32
    %c0_i32_2 = arith.constant 0 : i32
    return %c0_i32, %c0_i32_0, %c0_i32_1 : i32, i32, i32
  }
  func.func @transform_8(%arg0: i32) -> (i32, i32) {
    %c0_i32 = arith.constant 0 : i32
    %c0_i32_0 = arith.constant 0 : i32
    %c0_i32_1 = arith.constant 0 : i32
    return %c0_i32, %c0_i32_0 : i32, i32
  }
  func.func @transform_9(%arg0: i32) -> (i32, i32) {
    %c0_i32 = arith.constant 0 : i32
    %c0_i32_0 = arith.constant 0 : i32
    %c0_i32_1 = arith.constant 0 : i32
    return %c0_i32, %c0_i32_0 : i32, i32
  }
}

</mosaic_0001>

<bundles_post_ra>
// kernel: _lambda_.1
= control target key start
LH: loop header
LB: loop body
LE: loop exit
PB: predicated region body
PF: predicated region fallthrough
CT: control target
= control target key end

     0   :  { %vm92_vm0 = vcmask 1043456   ;;  %vm88_vm1 = vcmask 31744   ;;  %v2924_v0 = vmov 0.0   ;;  %vm2925_vm2 = vmmov 0   ;;  %s3857_s2 = inlined_call_operand.vmem [shape: f32[4,4,128], index: 2, kind: input, shape index: {}]   ;;  %s3858_s0 = inlined_call_operand.vmem [shape: f32[8,4], index: 0, kind: input, shape index: {}]   ;;  %s3859_s3 = inlined_call_operand.vmem [shape: f32[4,128,128], index: 3, kind: input, shape index: {}]   ;;  %s3860_s6 = inlined_call_operand.vmem [shape: f32[4,8,128], index: 6, kind: input, shape index: {}]   ;;  %s3861_s4 = inlined_call_operand.vmem [shape: f32[4,128,4], index: 4, kind: input, shape index: {}]   ;;  %s3862_s5 = inlined_call_operand.vmem [shape: f32[4,128,4], index: 5, kind: input, shape index: {}]   ;;  %s3863_s7 = inlined_call_operand.vmem [shape: f32[4,2,4], index: 7, kind: input, shape index: {}]   ;;  %s3864_s1 = inlined_call_operand.vmem [shape: f32[8,4], index: 1, kind: input, shape index: {}]   ;;  %s3865_s8 = inlined_call_operand.vmem [shape: f32[8,4], index: 8, kind: output, shape index: {0}]   ;;  %s3866_s9 = inlined_call_operand.vmem [shape: f32[8,1], index: 9, kind: output, shape index: {1}]  }
   0x1   :  { %2152 = vmatprep.subr.mxu1 %v2924_v0  ;;  %v33_v1 = vld [vmem:[%s3857_s2] sm:$0xf]  ;;  %2154 = vmatprep.mubr.msk.f32.mxu1 %vm2925_vm2, %v2924_v0  ;;  %v35_v4 = vld [vmem:[%s3859_s3 + $0x8] sm:$0xff]  ;;  %v2926_v6 = vmov 0.0|0.0   ;;  %v36_v7 = vld [vmem:[%s3859_s3 + $0x10] sm:$0xff]  ;;  %v84_v28 = vlaneseq  ;;  %vm1769_vm3 = vcmask 7168  }
   0x2   :  { %v2986_v2 = vld [vmem:[%s3858_s0] sm:$0xff]  ;;  %2153 = vmatpush3.msk.msra.mxu1 %vm92_vm0, %v33_v1  ;;  %2224 = vmatprep.mubr.msk.f32.mxu0 %vm2925_vm2, %v2924_v0  ;;  %v37_v8 = vld [vmem:[%s3859_s3 + $0x18] sm:$0xff]  ;;  %v39_v11 = vld [vmem:[%s3859_s3 + $0x28] sm:$0xff] }
   0x3   :  { %2155 = vmatmul.mubr.msk.f32.vlgmr.msra.gmra.mrb[0].mxu1 %vm88_vm1, %v2986_v2  ;;  %v34_v3 = vld [vmem:[%s3859_s3] sm:$0xff]  ;;  %2592 = vmatprep.subr.bf16.mxu1 %v2926_v6  ;;  %v2596_v9 = vpack.c.bf16 %v37_v8, %v36_v7  ;;  %v40_v13 = vld [vmem:[%s3859_s3 + $0x30] sm:$0xff]  ;;  %v41_v14 = vld [vmem:[%s3859_s3 + $0x38] sm:$0xff]  ;;  %v3053_v29 = vshrl.u32 %v84_v28, 7 }
   0x4   :  { %2189 = vmatprep.mubr.msk.f32.mxu1 %vm2925_vm2, %v2924_v0  ;;  %v2593_v5 = vpack.c.bf16 %v35_v4, %v34_v3  ;;  %2616 = vmatprep.subr.bf16.mxu0 %v2926_v6  ;;  %v38_v10 = vld [vmem:[%s3859_s3 + $0x20] sm:$0xff]  ;;  %v2602_v15 = vpack.c.bf16 %v41_v14, %v40_v13  ;;  %v43_v17 = vld [vmem:[%s3859_s3 + $0x48] sm:$0xff]  ;;  %v44_v19 = vld [vmem:[%s3859_s3 + $0x50] sm:$0xff] }
   0x5   :  { %v2599_v12 = vpack.c.bf16 %v39_v11, %v38_v10  ;;  %v42_v16 = vld [vmem:[%s3859_s3 + $0x40] sm:$0xff]  ;;  %v45_v20 = vld [vmem:[%s3859_s3 + $0x58] sm:$0xff]  ;;  %v47_v23 = vld [vmem:[%s3859_s3 + $0x68] sm:$0xff]  ;;  %v3056_v30 = vsub.s32 0, %v3053_v29  ;;  %v3066_v54 = vsub.s32 1, %v3053_v29  ;;  %v3069_v55 = vsub.s32 2, %v3053_v29 }
   0x6   :  { %2594 = vmatpush3.bf16.msra.mxu1 %v2593_v5  ;;  %v2605_v18 = vpack.c.bf16 %v43_v17, %v42_v16  ;;  %v2608_v21 = vpack.c.bf16 %v45_v20, %v44_v19  ;;  %v46_v22 = vld [vmem:[%s3859_s3 + $0x60] sm:$0xff]  ;;  %v48_v25 = vld [vmem:[%s3859_s3 + $0x70] sm:$0xff]  ;;  %v49_v26 = vld [vmem:[%s3859_s3 + $0x78] sm:$0xff] }
   0x7   :  { %2595 = vmatprep.subr.bf16.mxu1 %v2926_v6  ;;  %v2611_v24 = vpack.c.bf16 %v47_v23, %v46_v22  ;;  %v2614_v27 = vpack.c.bf16 %v49_v26, %v48_v25  ;;  %v3061_v31 = vld [vmem:[%s3860_s6] sm:$0xff]  ;;  %v51_v63 = vld [vmem:[%s3861_s4 + $0x8] sm:$0xff]  ;;  %v52_v7 = vld [vmem:[%s3861_s4 + $0x10] sm:$0xff] }
   0x8   :  { %v87_v32 = vrot.slane %v3061_v31, %v3056_v30  ;;  %v195_v59 = vrot.slane %v3061_v31, %v3069_v55  ;;  %v50_v62 = vld [vmem:[%s3861_s4] sm:$0xff]  ;;  %v67_v4 = vld [vmem:[%s3862_s5 + $0x8] sm:$0xff]  ;;  %v53_v8 = vld [vmem:[%s3861_s4 + $0x18] sm:$0xff] }
   0x9   :  { %v66_v1 = vld [vmem:[%s3862_s5] sm:$0xff]  ;;  %v2617_v3 = vpack.c.bf16 %v51_v63, %v50_v62  ;;  %v2620_v10 = vpack.c.bf16 %v53_v8, %v52_v7  ;;  %v69_v11 = vld [vmem:[%s3862_s5 + $0x18] sm:$0xff]  ;;  %v55_v14 = vld [vmem:[%s3861_s4 + $0x28] sm:$0xff] }
   0xa   :  { %2597 = vmatpush3.bf16.msra.mxu1 %v2596_v9  ;;  %v2641_v5 = vpack.c.bf16 %v67_v4, %v66_v1  ;;  %v68_v9 = vld [vmem:[%s3862_s5 + $0x10] sm:$0xff]  ;;  %v54_v13 = vld [vmem:[%s3861_s4 + $0x20] sm:$0xff]  ;;  %v71_v17 = vld [vmem:[%s3862_s5 + $0x28] sm:$0xff] }
   0xb   :  { %2598 = vmatprep.subr.bf16.mxu1 %v2926_v6  ;;  %2618 = vmatpush3.bf16.msra.mxu0 %v2617_v3  ;;  %v2623_v16 = vpack.c.bf16 %v55_v14, %v54_v13  ;;  %v56_v19 = vld [vmem:[%s3861_s4 + $0x30] sm:$0xff]  ;;  %v57_v20 = vld [vmem:[%s3861_s4 + $0x38] sm:$0xff]  ;;  %v58_v25 = vld [vmem:[%s3861_s4 + $0x40] sm:$0xff] }
   0xc   :  { %2619 = vmatprep.subr.bf16.mxu0 %v2926_v6  ;;  %v2626_v22 = vpack.c.bf16 %v57_v20, %v56_v19  ;;  %v73_v23 = vld [vmem:[%s3862_s5 + $0x38] sm:$0xff]  ;;  %v59_v26 = vld [vmem:[%s3861_s4 + $0x48] sm:$0xff] }
   0xd   :  { %v2629_v28 = vpack.c.bf16 %v59_v26, %v58_v25  ;;  %v1784_v26 = vld [vmem:[%s3859_s3 + $0x90] sm:$0xff] }
   0xe   :  { %2600 = vmatpush3.bf16.msra.mxu1 %v2599_v12  ;;  %v2644_v12 = vpack.c.bf16 %v69_v11, %v68_v9 }
   0xf   :  { %2601 = vmatprep.subr.bf16.mxu1 %v2926_v6  ;;  %2621 = vmatpush3.bf16.msra.mxu0 %v2620_v10 }
  0x10   :  { %2622 = vmatprep.subr.bf16.mxu0 %v2926_v6 }
  0x12   :  { %2603 = vmatpush3.bf16.msra.mxu1 %v2602_v15  ;;  %v70_v15 = vld [vmem:[%s3862_s5 + $0x20] sm:$0xff] }
  0x13   :  { %2604 = vmatprep.subr.bf16.mxu1 %v2926_v6  ;;  %2624 = vmatpush3.bf16.msra.mxu0 %v2623_v16  ;;  %v3195_v16 = vsub.s32 4, %v3053_v29 }
  0x14   :  { %2625 = vmatprep.subr.bf16.mxu0 %v2926_v6 }
  0x16   :  { %2606 = vmatpush3.bf16.msra.mxu1 %v2605_v18  ;;  %v2647_v18 = vpack.c.bf16 %v71_v17, %v70_v15  ;;  %v3198_v17 = vsub.s32 5, %v3053_v29 }
  0x17   :  { %2607 = vmatprep.subr.bf16.mxu1 %v2926_v6  ;;  %2627 = vmatpush3.bf16.msra.mxu0 %v2626_v22 }
  0x18   :  { %2628 = vmatprep.subr.bf16.mxu0 %v2926_v6 }
  0x1a   :  { %2609 = vmatpush3.bf16.msra.mxu1 %v2608_v21  ;;  %v72_v21 = vld [vmem:[%s3862_s5 + $0x30] sm:$0xff] }
  0x1b   :  { %2610 = vmatprep.subr.bf16.mxu1 %v2926_v6  ;;  %2630 = vmatpush3.bf16.msra.mxu0 %v2629_v28 }
  0x1c   :  { %2631 = vmatprep.subr.bf16.mxu0 %v2926_v6 }
  0x1e   :  { %2612 = vmatpush3.bf16.msra.mxu1 %v2611_v24  ;;  %v2650_v24 = vpack.c.bf16 %v73_v23, %v72_v21  ;;  %v299_v21 = vrot.slane %v3061_v31, %v3198_v17 }
  0x1f   :  { %2613 = vmatprep.subr.bf16.mxu1 %v2926_v6 }
  0x22   :  { %2615 = vmatpush3.bf16.msra.mxu1 %v2614_v27  ;;  %v74_v27 = vld [vmem:[%s3862_s5 + $0x40] sm:$0xff] }
  0x23   :  { %2640 = vmatprep.subr.bf16.mxu1 %v2926_v6 }
  0xd6   :  { %v162_v33 = vpop.f32.mrb[0].mxu1 }
  0xd7   :  { %v163_v34 = vadd.f32 %v162_v33, %v87_v32  ;;  %v2156_v35 = vpop.f32.mrb[1].mxu1  ;;  %v75_v32 = vld [vmem:[%s3862_s5 + $0x48] sm:$0xff]  ;;  %v60_v33 = vld [vmem:[%s3861_s4 + $0x50] sm:$0xff] }
  0xd8   :  { %v2653_v35 = vpack.c.bf16 %v75_v32, %v74_v27  ;;  %v1785_v27 = vld [vmem:[%s3859_s3 + $0x98] sm:$0xff]  ;;  %v1786_v32 = vld [vmem:[%s3859_s3 + $0xa0] sm:$0xff] }
  0xd9   :  { %v166_v36 = vmax.f32 %v163_v34, 0.0  ;;  %v61_v34 = vld [vmem:[%s3861_s4 + $0x58] sm:$0xff]  ;;  %v2668_v28 = vpack.c.bf16 %v1785_v27, %v1784_v26 }
  0xdb   :  { %v167_v37 = vrot.slane %v166_v36, 4 }
  0xdd   :  { %v168_v38 = vadd.f32 %v167_v37, %v166_v36  ;;  %v77_v37 = vld [vmem:[%s3862_s5 + $0x58] sm:$0xff] }
  0xdf   :  { %v169_v39 = vrot.slane %v168_v38, 2 }
  0xe1   :  { %v170_v40 = vadd.f32 %v169_v39, %v168_v38  ;;  %v2632_v38 = vpack.c.bf16 %v61_v34, %v60_v33  ;;  %v1787_v33 = vld [vmem:[%s3859_s3 + $0xa8] sm:$0xff] }
  0xe2   :  { %v2671_v34 = vpack.c.bf16 %v1787_v33, %v1786_v32 }
  0xe3   :  { %v171_v41 = vrot.slane %v170_v40, 1  ;;  %2633 = vmatpush3.bf16.msra.mxu0 %v2632_v38  ;;  %v1790_v38 = vld [vmem:[%s3859_s3 + $0xc0] sm:$0xff] }
  0xe4   :  { %2634 = vmatprep.subr.bf16.mxu0 %v2926_v6 }
  0xe5   :  { %v172_v42 = vadd.f32 %v171_v41, %v170_v40  ;;  %v62_v40 = vld [vmem:[%s3861_s4 + $0x60] sm:$0xff]  ;;  %v63_v41 = vld [vmem:[%s3861_s4 + $0x68] sm:$0xff] }
  0xe7   :  { %v174_v43 = vmul.f32 0.125, %v172_v42  ;;  %v78_v42 = vld [vmem:[%s3862_s5 + $0x60] sm:$0xff] }
  0xe9   :  { %v175_v44 = vsub.f32 %v166_v36, %v174_v43  ;;  %v76_v36 = vld [vmem:[%s3862_s5 + $0x50] sm:$0xff]  ;;  %v79_v43 = vld [vmem:[%s3862_s5 + $0x68] sm:$0xff] }
  0xea   :  { %v2656_v39 = vpack.c.bf16 %v77_v37, %v76_v36  ;;  %v1789_v36 = vld [vmem:[%s3859_s3 + $0xb8] sm:$0xff] }
  0xeb   :  { %v176_v45 = vmul.f32 %v175_v44, %v175_v44 }
  0xed   :  { %v177_v46 = vrot.slane %v176_v45, 4 }
  0xef   :  { %v178_v47 = vadd.f32 %v177_v46, %v176_v45  ;;  %v2659_v45 = vpack.c.bf16 %v79_v43, %v78_v42  ;;  %v64_v46 = vld [vmem:[%s3861_s4 + $0x70] sm:$0xff]  ;;  %v1793_v42 = vld [vmem:[%s3859_s3 + $0xd8] sm:$0xff] }
  0xf1   :  { %v179_v48 = vrot.slane %v178_v47, 2 }
  0xf3   :  { %v180_v49 = vadd.f32 %v179_v48, %v178_v47  ;;  %v65_v47 = vld [vmem:[%s3861_s4 + $0x78] sm:$0xff]  ;;  %v80_v48 = vld [vmem:[%s3862_s5 + $0x70] sm:$0xff] }
  0xf5   :  { %v181_v50 = vrot.slane %v180_v49, 1 }
  0xf7   :  { %v182_v51 = vadd.f32 %v181_v50, %v180_v49  ;;  %v81_v49 = vld [vmem:[%s3862_s5 + $0x78] sm:$0xff]  ;;  %v2638_v50 = vpack.c.bf16 %v65_v47, %v64_v46  ;;  %v1796_v47 = vld [vmem:[%s3859_s3 + $0xf0] sm:$0xff] }
  0xf9   :  { %v183_v52 = vmul.f32 0.125, %v182_v51  ;;  %v2662_v51 = vpack.c.bf16 %v81_v49, %v80_v48  ;;  %v1797_v48 = vld [vmem:[%s3859_s3 + $0xf8] sm:$0xff] }
  0xfa   :  { %v2686_v49 = vpack.c.bf16 %v1797_v48, %v1796_v47 }
  0xfb   :  { %v184_v53 = vadd.f32 1e-05, %v183_v52  ;;  %v3190_v52 = vsub.s32 3, %v3053_v29  ;;  %v1782_v29 = vld [vmem:[%s3859_s3 + $0x80] sm:$0xff] }
  0xfd   :  { %2883 = vrsqrt.f32 %v184_v53  ;;  %v200_v53 = vrot.slane %v3061_v31, %v3190_v52 }
 0x107   :  { %v2884_v56 = vpop.eup %2883 }
 0x108   :  { %v186_v57 = vmul.f32 %v2884_v56, %v3061_v31 }
 0x10a   :  { %v190_v58 = vrot.slane %v186_v57, %v3066_v54 }
 0x10c   :  { %v191_v60 = vmul.f32 %v190_v58, %v175_v44  ;;  %v2635_v44 = vpack.c.bf16 %v63_v41, %v62_v40  ;;  %v1792_v41 = vld [vmem:[%s3859_s3 + $0xd0] sm:$0xff] }
 0x10d   :  { %v2680_v43 = vpack.c.bf16 %v1793_v42, %v1792_v41 }
 0x10e   :  { %v196_v61 = vadd.f32 %v195_v59, %v191_v60  ;;  %2636 = vmatpush3.bf16.msra.mxu0 %v2635_v44  ;;  %v1794_v44 = vld [vmem:[%s3859_s3 + $0xe0] sm:$0xff] }
 0x10f   :  { %2637 = vmatprep.subr.bf16.mxu0 %v2926_v6 }
 0x110   :  { %2190 = vmatmul.mubr.f32.vlgmr.msra.gmra.mrb[2].mxu1 %v196_v61 }
 0x111   :  { %2259 = vmatprep.mubr.msk.f32.mxu1 %vm2925_vm2, %v2924_v0  ;;  %2642 = vmatpush3.bf16.msra.mxu1 %v2641_v5 }
 0x112   :  { %2643 = vmatprep.subr.bf16.mxu1 %v2926_v6  ;;  %2639 = vmatpush3.bf16.msra.mxu0 %v2638_v50  ;;  %v83_v50 = vld [vmem:[%s3863_s7] sm:$0x3] }
 0x113   :  { %2262 = vmatprep.subr.mxu0 %v2924_v0 }
 0x115   :  { %2645 = vmatpush3.bf16.msra.mxu1 %v2644_v12 }
 0x116   :  { %2646 = vmatprep.subr.bf16.mxu1 %v2926_v6 }
 0x119   :  { %2648 = vmatpush3.bf16.msra.mxu1 %v2647_v18 }
 0x11a   :  { %2649 = vmatprep.subr.bf16.mxu1 %v2926_v6 }
 0x11d   :  { %2651 = vmatpush3.bf16.msra.mxu1 %v2650_v24  ;;  %v1781_v24 = vld [vmem:[%s3857_s2 + $0x4] sm:$0xf] }
 0x11e   :  { %2652 = vmatprep.subr.bf16.mxu1 %v2926_v6 }
 0x121   :  { %2654 = vmatpush3.bf16.msra.mxu1 %v2653_v35  ;;  %v1788_v35 = vld [vmem:[%s3859_s3 + $0xb0] sm:$0xff] }
 0x122   :  { %2655 = vmatprep.subr.bf16.mxu1 %v2926_v6  ;;  %v2674_v37 = vpack.c.bf16 %v1789_v36, %v1788_v35 }
 0x125   :  { %2657 = vmatpush3.bf16.msra.mxu1 %v2656_v39  ;;  %v1791_v39 = vld [vmem:[%s3859_s3 + $0xc8] sm:$0xff] }
 0x126   :  { %2658 = vmatprep.subr.bf16.mxu1 %v2926_v6  ;;  %v2677_v40 = vpack.c.bf16 %v1791_v39, %v1790_v38  ;;  %v378_v38 = vrot.slane %v83_v50, %v3066_v54  ;;  %v32_v39 = vld [vmem:[%s3864_s1] sm:$0xff] }
 0x129   :  { %2660 = vmatpush3.bf16.msra.mxu1 %v2659_v45  ;;  %v1795_v45 = vld [vmem:[%s3859_s3 + $0xe8] sm:$0xff] }
 0x12a   :  { %2661 = vmatprep.subr.bf16.mxu1 %v2926_v6  ;;  %v2683_v46 = vpack.c.bf16 %v1795_v45, %v1794_v44 }
 0x12d   :  { %2663 = vmatpush3.bf16.msra.mxu1 %v2662_v51  ;;  %v304_v51 = vrot.slane %v83_v50, %v3056_v30  ;;  %v1798_v50 = vld [vmem:[%s3861_s4 + $0x80] sm:$0xff] }
 0x12e   :  { %2688 = vmatprep.subr.bf16.mxu1 %v2926_v6 }
 0x1e3   :  { %v267_v56 = vpop.f32.mrb[2].mxu1 }
 0x1e4   :  { %v268_v57 = vadd.f32 %v267_v56, %v200_v53  ;;  %v2191_v58 = vpop.f32.mrb[3].mxu1  ;;  %v3280_v53 = vld [vmem:[%s3860_s6 + $0x8] sm:$0xff] }
 0x1e5   :  { %v628_v47 = vrot.slane %v3280_v53, %v3069_v55 }
 0x1e6   :  { %v271_v59 = vmax.f32 %v268_v57, 0.0 }
 0x1e8   :  { %v272_v60 = vrot.slane %v271_v59, 4 }
 0x1ea   :  { %v273_v61 = vadd.f32 %v272_v60, %v271_v59 }
 0x1ec   :  { %v274_v62 = vrot.slane %v273_v61, 2 }
 0x1ee   :  { %v275_v63 = vadd.f32 %v274_v62, %v273_v61  ;;  %v526_v61 = vrot.slane %v3280_v53, %v3056_v30 }
 0x1f0   :  { %v276_v1 = vrot.slane %v275_v63, 1 }
 0x1f2   :  { %v277_v3 = vadd.f32 %v276_v1, %v275_v63 }
 0x1f4   :  { %v278_v4 = vmul.f32 0.125, %v277_v3 }
 0x1f6   :  { %v279_v5 = vsub.f32 %v271_v59, %v278_v4 }
 0x1f8   :  { %v280_v7 = vmul.f32 %v279_v5, %v279_v5 }
 0x1fa   :  { %v281_v8 = vrot.slane %v280_v7, 4 }
 0x1fc   :  { %v282_v9 = vadd.f32 %v281_v8, %v280_v7 }
 0x1fe   :  { %v283_v10 = vrot.slane %v282_v9, 2 }
 0x200   :  { %v284_v11 = vadd.f32 %v283_v10, %v282_v9 }
 0x202   :  { %v285_v12 = vrot.slane %v284_v11, 1 }
 0x204   :  { %v286_v13 = vadd.f32 %v285_v12, %v284_v11 }
 0x206   :  { %v287_v14 = vmul.f32 0.125, %v286_v13 }
 0x208   :  { %v288_v15 = vadd.f32 1e-05, %v287_v14 }
 0x20a   :  { %2885 = vrsqrt.f32 %v288_v15 }
 0x214   :  { %v2886_v18 = vpop.eup %2885 }
 0x215   :  { %v290_v19 = vmul.f32 %v2886_v18, %v3061_v31  ;;  %v1783_v31 = vld [vmem:[%s3859_s3 + $0x88] sm:$0xff] }
 0x216   :  { %v2665_v25 = vpack.c.bf16 %v1783_v31, %v1782_v29 }
 0x217   :  { %v294_v20 = vrot.slane %v290_v19, %v3195_v16 }
 0x219   :  { %v295_v22 = vmul.f32 %v294_v20, %v279_v5 }
 0x21b   :  { %v300_v23 = vadd.f32 %v299_v21, %v295_v22 }
 0x21d   :  { %2225 = vmatmul.mubr.f32.vlgmr.msra.gmra.mrb[0].mxu0 %v300_v23  ;;  %2260 = vmatmul.mubr.f32.vlgmr.msra.gmra.mrb[4].mxu1 %v300_v23 }
 0x21e   :  { %2263 = vmatpush3.msk.msra.mxu0 %vm92_vm0, %v1781_v24  ;;  %2264 = vmatprep.mubr.msk.f32.mxu0 %vm2925_vm2, %v2924_v0 }
 0x21f   :  { %2664 = vmatprep.subr.bf16.mxu0 %v2926_v6  ;;  %2334 = vmatprep.mubr.msk.f32.mxu1 %vm2925_vm2, %v2924_v0 }
 0x221   :  { %2265 = vmatmul.mubr.msk.f32.vlgmr.msra.gmra.mrb[2].mxu0 %vm88_vm1, %v2986_v2 }
 0x222   :  { %2299 = vmatprep.mubr.msk.f32.mxu0 %vm2925_vm2, %v2924_v0  ;;  %2666 = vmatpush3.bf16.msra.mxu0 %v2665_v25 }
 0x223   :  { %2667 = vmatprep.subr.bf16.mxu0 %v2926_v6 }
 0x226   :  { %2669 = vmatpush3.bf16.msra.mxu0 %v2668_v28 }
 0x227   :  { %2670 = vmatprep.subr.bf16.mxu0 %v2926_v6 }
 0x22a   :  { %2672 = vmatpush3.bf16.msra.mxu0 %v2671_v34 }
 0x22b   :  { %2673 = vmatprep.subr.bf16.mxu0 %v2926_v6 }
 0x22e   :  { %2675 = vmatpush3.bf16.msra.mxu0 %v2674_v37 }
 0x22f   :  { %2676 = vmatprep.subr.bf16.mxu0 %v2926_v6 }
 0x232   :  { %2678 = vmatpush3.bf16.msra.mxu0 %v2677_v40 }
 0x233   :  { %2679 = vmatprep.subr.bf16.mxu0 %v2926_v6 }
 0x236   :  { %2681 = vmatpush3.bf16.msra.mxu0 %v2680_v43 }
 0x237   :  { %2682 = vmatprep.subr.bf16.mxu0 %v2926_v6 }
 0x23a   :  { %2684 = vmatpush3.bf16.msra.mxu0 %v2683_v46 }
 0x23b   :  { %2685 = vmatprep.subr.bf16.mxu0 %v2926_v6 }
 0x23e   :  { %2687 = vmatpush3.bf16.msra.mxu0 %v2686_v49 }
 0x23f   :  { %2712 = vmatprep.subr.bf16.mxu0 %v2926_v6 }
 0x2f0   :  { %v371_v56 = vpop.f32.mrb[0].mxu0  ;;  %v445_v57 = vpop.f32.mrb[4].mxu1 }
 0x2f1   :  { %v372_v58 = vadd.f32 %v371_v56, %v304_v51  ;;  %v2226_v59 = vpop.f32.mrb[1].mxu0  ;;  %v2261_v60 = vpop.f32.mrb[5].mxu1  ;;  %v446_v42 = vadd.f32 %v445_v57, %v378_v38  ;;  %v1799_v51 = vld [vmem:[%s3861_s4 + $0x88] sm:$0xff]  ;;  %v1814_v56 = vld [vmem:[%s3862_s5 + $0x80] sm:$0xff] }
 0x2f2   :  { %v2689_v57 = vpack.c.bf16 %v1799_v51, %v1798_v50  ;;  %v1800_v60 = vld [vmem:[%s3861_s4 + $0x90] sm:$0xff]  ;;  %v1827_v38 = vld [vmem:[%s3862_s5 + $0xe8] sm:$0xff] }
 0x2f3   :  { %v449_v62 = vadd.f32 2.0, %v372_v58  ;;  %v1815_v58 = vld [vmem:[%s3862_s5 + $0x88] sm:$0xff] }
 0x2f4   :  { %v596_v63 = vpop.f32.mrb[2].mxu0  ;;  %v2713_v59 = vpack.c.bf16 %v1815_v58, %v1814_v56  ;;  %2690 = vmatpush3.bf16.msra.mxu1 %v2689_v57 }
 0x2f5   :  { %v452_v1 = vand.u32 2147483647, %v449_v62  ;;  %v597_v3 = vadd.f32 %v596_v63, %v526_v61  ;;  %v2266_v4 = vpop.f32.mrb[3].mxu0  ;;  %v450_v24 = vsub.f32 0.0, %v449_v62  ;;  %2691 = vmatprep.subr.bf16.mxu1 %v2926_v6  ;;  %v1801_v61 = vld [vmem:[%s3861_s4 + $0x98] sm:$0xff]  ;;  %v1816_v62 = vld [vmem:[%s3862_s5 + $0x90] sm:$0xff] }
 0x2f6   :  { %v2692_v63 = vpack.c.bf16 %v1801_v61, %v1800_v60  ;;  %v1802_v4 = vld [vmem:[%s3861_s4 + $0xa0] sm:$0xff] }
 0x2f7   :  { %v453_v5 = vsub.f32 0.0, %v452_v1  ;;  %v600_v7 = vmax.f32 %v597_v3, 0.0  ;;  %v451_v26 = vmax.f32 %v450_v24, 0.0  ;;  %v1817_v1 = vld [vmem:[%s3862_s5 + $0x98] sm:$0xff] }
 0x2f8   :  { %v2716_v3 = vpack.c.bf16 %v1817_v1, %v1816_v62  ;;  %2693 = vmatpush3.bf16.msra.mxu1 %v2692_v63 }
 0x2f9   :  { %v454_v8 = vmul.f32 1.442695, %v453_v5  ;;  %v601_v9 = vrot.slane %v600_v7, 4  ;;  %2694 = vmatprep.subr.bf16.mxu1 %v2926_v6  ;;  %v1803_v5 = vld [vmem:[%s3861_s4 + $0xa8] sm:$0xff] }
 0x2fb   :  { %2887 = vpow2.f32 %v454_v8  ;;  %v602_v10 = vadd.f32 %v601_v9, %v600_v7  ;;  %v2695_v8 = vpack.c.bf16 %v1803_v5, %v1802_v4  ;;  %v1819_v9 = vld [vmem:[%s3862_s5 + $0xa8] sm:$0xff] }
 0x2fd   :  { %v603_v11 = vrot.slane %v602_v10, 2  ;;  %2696 = vmatpush3.bf16.msra.mxu1 %v2695_v8 }
 0x2fe   :  { %2697 = vmatprep.subr.bf16.mxu1 %v2926_v6 }
 0x2ff   :  { %v604_v12 = vadd.f32 %v603_v11, %v602_v10  ;;  %v1804_v11 = vld [vmem:[%s3861_s4 + $0xb0] sm:$0xff] }
 0x301   :  { %v605_v13 = vrot.slane %v604_v12, 1 }
 0x303   :  { %v606_v14 = vadd.f32 %v605_v13, %v604_v12  ;;  %v1805_v12 = vld [vmem:[%s3861_s4 + $0xb8] sm:$0xff]  ;;  %v1820_v13 = vld [vmem:[%s3862_s5 + $0xb0] sm:$0xff] }
 0x305   :  { %v2888_v15 = vpop.eup %2887  ;;  %v607_v18 = vmul.f32 0.125, %v606_v14  ;;  %v2698_v14 = vpack.c.bf16 %v1805_v12, %v1804_v11 }
 0x306   :  { %v456_v19 = vadd.f32 1.0, %v2888_v15  ;;  %v1821_v15 = vld [vmem:[%s3862_s5 + $0xb8] sm:$0xff] }
 0x307   :  { %v608_v20 = vsub.f32 %v600_v7, %v607_v18  ;;  %v1818_v7 = vld [vmem:[%s3862_s5 + $0xa0] sm:$0xff]  ;;  %v2722_v18 = vpack.c.bf16 %v1821_v15, %v1820_v13  ;;  %2699 = vmatpush3.bf16.msra.mxu1 %v2698_v14  ;;  %v732_v15 = vrot.slane %v3280_v53, %v3198_v17 }
 0x308   :  { %2889 = vlog2.f32 %v456_v19  ;;  %v2719_v10 = vpack.c.bf16 %v1819_v9, %v1818_v7  ;;  %2700 = vmatprep.subr.bf16.mxu1 %v2926_v6  ;;  %v1806_v19 = vld [vmem:[%s3861_s4 + $0xc0] sm:$0xff] }
 0x309   :  { %v609_v21 = vmul.f32 %v608_v20, %v608_v20 }
 0x30b   :  { %v610_v22 = vrot.slane %v609_v21, 4 }
 0x30d   :  { %v611_v23 = vadd.f32 %v610_v22, %v609_v21  ;;  %v1822_v21 = vld [vmem:[%s3862_s5 + $0xc0] sm:$0xff] }
 0x30f   :  { %v612_v29 = vrot.slane %v611_v23, 2 }
 0x311   :  { %v613_v31 = vadd.f32 %v612_v29, %v611_v23  ;;  %v1823_v23 = vld [vmem:[%s3862_s5 + $0xc8] sm:$0xff]  ;;  %v1808_v29 = vld [vmem:[%s3861_s4 + $0xd0] sm:$0xff] }
 0x312   :  { %v2890_v25 = vpop.eup %2889  ;;  %v2725_v24 = vpack.c.bf16 %v1823_v23, %v1822_v21  ;;  %v1836_v21 = vld [vmem:[%s3859_s3 + $0x108] sm:$0xff]  ;;  %v1837_v23 = vld [vmem:[%s3859_s3 + $0x110] sm:$0xff] }
 0x313   :  { %v458_v27 = vmul.f32 0.6931472, %v2890_v25  ;;  %v614_v28 = vrot.slane %v613_v31, 1  ;;  %v1824_v25 = vld [vmem:[%s3862_s5 + $0xd0] sm:$0xff] }
 0x315   :  { %v3284_v32 = vadd.f32 %v458_v27, %v451_v26  ;;  %v615_v33 = vadd.f32 %v614_v28, %v613_v31  ;;  %v1809_v31 = vld [vmem:[%s3861_s4 + $0xd8] sm:$0xff] }
 0x316   :  { %v2704_v26 = vpack.c.bf16 %v1809_v31, %v1808_v29  ;;  %v1825_v27 = vld [vmem:[%s3862_s5 + $0xd8] sm:$0xff]  ;;  %v1839_v29 = vld [vmem:[%s3859_s3 + $0x120] sm:$0xff]  ;;  %v1840_v31 = vld [vmem:[%s3859_s3 + $0x128] sm:$0xff] }
 0x317   :  { %v460_v34 = vsub.f32 0.0, %v3284_v32  ;;  %v616_v35 = vmul.f32 0.125, %v615_v33  ;;  %v2728_v28 = vpack.c.bf16 %v1825_v27, %v1824_v25  ;;  %v1810_v33 = vld [vmem:[%s3861_s4 + $0xe0] sm:$0xff]  ;;  %v2743_v25 = vpack.c.bf16 %v1840_v31, %v1839_v29  ;;  %v1842_v27 = vld [vmem:[%s3859_s3 + $0x138] sm:$0xff] }
 0x319   :  { %v461_v36 = vmul.f32 1.442695, %v460_v34  ;;  %v617_v37 = vadd.f32 1e-05, %v616_v35  ;;  %v1811_v35 = vld [vmem:[%s3861_s4 + $0xe8] sm:$0xff] }
 0x31b   :  { %2891 = vpow2.f32 %v461_v36  ;;  %v1826_v36 = vld [vmem:[%s3862_s5 + $0xe0] sm:$0xff] }
 0x31c   :  { %2893 = vrsqrt.f32 %v617_v37  ;;  %v2707_v37 = vpack.c.bf16 %v1811_v35, %v1810_v33  ;;  %v1843_v33 = vld [vmem:[%s3859_s3 + $0x140] sm:$0xff]  ;;  %v1844_v35 = vld [vmem:[%s3859_s3 + $0x148] sm:$0xff] }
 0x325   :  { %v2892_v40 = vpop.eup %2891 }
 0x326   :  { %v2894_v41 = vpop.eup %2893  ;;  %v463_v43 = vmul.f32 %v2892_v40, %v32_v39  ;;  %v2731_v39 = vpack.c.bf16 %v1827_v38, %v1826_v36  ;;  %v1812_v40 = vld [vmem:[%s3861_s4 + $0xf0] sm:$0xff]  ;;  %v2749_v36 = vpack.c.bf16 %v1844_v35, %v1843_v33  ;;  %v1846_v38 = vld [vmem:[%s3859_s3 + $0x158] sm:$0xff] }
 0x327   :  { %v619_v44 = vmul.f32 %v2894_v41, %v3280_v53  ;;  %v1813_v41 = vld [vmem:[%s3861_s4 + $0xf8] sm:$0xff] }
 0x328   :  { %v3294_v45 = vadd.f32 %v463_v43, %v446_v42  ;;  %v1828_v42 = vld [vmem:[%s3862_s5 + $0xf0] sm:$0xff]  ;;  %v2710_v43 = vpack.c.bf16 %v1813_v41, %v1812_v40  ;;  %v1847_v40 = vld [vmem:[%s3859_s3 + $0x160] sm:$0xff]  ;;  %v1848_v41 = vld [vmem:[%s3859_s3 + $0x168] sm:$0xff] }
 0x329   :  { %v623_v46 = vrot.slane %v619_v44, %v3066_v54  ;;  %v1829_v44 = vld [vmem:[%s3862_s5 + $0xf8] sm:$0xff] }
 0x32b   :  { %v624_v48 = vmul.f32 %v623_v46, %v608_v20  ;;  %v1807_v20 = vld [vmem:[%s3861_s4 + $0xc8] sm:$0xff]  ;;  %v2734_v46 = vpack.c.bf16 %v1829_v44, %v1828_v42  ;;  %v2755_v42 = vpack.c.bf16 %v1848_v41, %v1847_v40  ;;  %v1850_v44 = vld [vmem:[%s3859_s3 + $0x178] sm:$0xff] }
 0x32c   :  { %v2701_v22 = vpack.c.bf16 %v1807_v20, %v1806_v19  ;;  %v1834_v20 = vld [vmem:[%s3857_s2 + $0x8] sm:$0xf] }
 0x32d   :  { %v629_v49 = vadd.f32 %v628_v47, %v624_v48  ;;  %v633_v47 = vrot.slane %v3280_v53, %v3190_v52 }
 0x32e   :  { %2702 = vmatpush3.bf16.msra.mxu1 %v2701_v22 }
 0x32f   :  { %2300 = vmatmul.mubr.f32.vlgmr.msra.gmra.mrb[4].mxu0 %v629_v49  ;;  %2703 = vmatprep.subr.bf16.mxu1 %v2926_v6 }
 0x330   :  { %2369 = vmatprep.mubr.msk.f32.mxu0 %vm2925_vm2, %v2924_v0  ;;  %2714 = vmatpush3.bf16.msra.mxu0 %v2713_v59 }
 0x331   :  { %2715 = vmatprep.subr.bf16.mxu0 %v2926_v6 }
 0x332   :  { %2705 = vmatpush3.bf16.msra.mxu1 %v2704_v26  ;;  %v1841_v26 = vld [vmem:[%s3859_s3 + $0x130] sm:$0xff] }
 0x333   :  { %2706 = vmatprep.subr.bf16.mxu1 %v2926_v6 }
 0x334   :  { %2717 = vmatpush3.bf16.msra.mxu0 %v2716_v3 }
 0x335   :  { %2718 = vmatprep.subr.bf16.mxu0 %v2926_v6 }
 0x336   :  { %2708 = vmatpush3.bf16.msra.mxu1 %v2707_v37  ;;  %v1845_v37 = vld [vmem:[%s3859_s3 + $0x150] sm:$0xff] }
 0x337   :  { %2709 = vmatprep.subr.bf16.mxu1 %v2926_v6 }
 0x338   :  { %2720 = vmatpush3.bf16.msra.mxu0 %v2719_v10 }
 0x339   :  { %2721 = vmatprep.subr.bf16.mxu0 %v2926_v6 }
 0x33a   :  { %2711 = vmatpush3.bf16.msra.mxu1 %v2710_v43  ;;  %v1849_v43 = vld [vmem:[%s3859_s3 + $0x170] sm:$0xff] }
 0x33b   :  { %2372 = vmatprep.subr.mxu1 %v2924_v0 }
 0x33c   :  { %2723 = vmatpush3.bf16.msra.mxu0 %v2722_v18 }
 0x33d   :  { %2724 = vmatprep.subr.bf16.mxu0 %v2926_v6 }
 0x340   :  { %2726 = vmatpush3.bf16.msra.mxu0 %v2725_v24 }
 0x341   :  { %2727 = vmatprep.subr.bf16.mxu0 %v2926_v6 }
 0x344   :  { %2729 = vmatpush3.bf16.msra.mxu0 %v2728_v28  ;;  %v2746_v28 = vpack.c.bf16 %v1842_v27, %v1841_v26 }
 0x345   :  { %2730 = vmatprep.subr.bf16.mxu0 %v2926_v6 }
 0x348   :  { %2732 = vmatpush3.bf16.msra.mxu0 %v2731_v39  ;;  %v2752_v39 = vpack.c.bf16 %v1846_v38, %v1845_v37 }
 0x349   :  { %2733 = vmatprep.subr.bf16.mxu0 %v2926_v6 }
 0x34c   :  { %2735 = vmatpush3.bf16.msra.mxu0 %v2734_v46  ;;  %v2758_v46 = vpack.c.bf16 %v1850_v44, %v1849_v43 }
 0x34d   :  { %2760 = vmatprep.subr.bf16.mxu0 %v2926_v6 }
 0x402   :  { %v700_v48 = vpop.f32.mrb[4].mxu0 }
 0x403   :  { %v701_v49 = vadd.f32 %v700_v48, %v633_v47  ;;  %v2301_v50 = vpop.f32.mrb[5].mxu0  ;;  %v1831_v47 = vld [vmem:[%s3863_s7 + $0x2] sm:$0x3] }
 0x404   :  { %v737_v48 = vrot.slane %v1831_v47, %v3056_v30  ;;  %v811_v37 = vrot.slane %v1831_v47, %v3066_v54  ;;  %v1851_v47 = vld [vmem:[%s3861_s4 + $0x100] sm:$0xff] }
 0x405   :  { %v704_v51 = vmax.f32 %v701_v49, 0.0  ;;  %v3495_v49 = vld [vmem:[%s3860_s6 + $0x10] sm:$0xff] }
 0x406   :  { %v1061_v32 = vrot.slane %v3495_v49, %v3069_v55 }
 0x407   :  { %v705_v56 = vrot.slane %v704_v51, 4 }
 0x409   :  { %v706_v57 = vadd.f32 %v705_v56, %v704_v51 }
 0x40b   :  { %v707_v58 = vrot.slane %v706_v57, 2 }
 0x40d   :  { %v708_v59 = vadd.f32 %v707_v58, %v706_v57 }
 0x40f   :  { %v709_v60 = vrot.slane %v708_v59, 1 }
 0x411   :  { %v710_v61 = vadd.f32 %v709_v60, %v708_v59  ;;  %v959_v59 = vrot.slane %v3495_v49, %v3056_v30 }
 0x413   :  { %v711_v62 = vmul.f32 0.125, %v710_v61 }
 0x415   :  { %v712_v63 = vsub.f32 %v704_v51, %v711_v62 }
 0x417   :  { %v713_v1 = vmul.f32 %v712_v63, %v712_v63 }
 0x419   :  { %v714_v3 = vrot.slane %v713_v1, 4 }
 0x41b   :  { %v715_v4 = vadd.f32 %v714_v3, %v713_v1 }
 0x41d   :  { %v716_v5 = vrot.slane %v715_v4, 2 }
 0x41f   :  { %v717_v7 = vadd.f32 %v716_v5, %v715_v4 }
 0x421   :  { %v718_v8 = vrot.slane %v717_v7, 1 }
 0x423   :  { %v719_v9 = vadd.f32 %v718_v8, %v717_v7 }
 0x425   :  { %v720_v10 = vmul.f32 0.125, %v719_v9 }
 0x427   :  { %v721_v11 = vadd.f32 1e-05, %v720_v10 }
 0x429   :  { %2895 = vrsqrt.f32 %v721_v11 }
 0x433   :  { %v2896_v12 = vpop.eup %2895 }
 0x434   :  { %v723_v13 = vmul.f32 %v2896_v12, %v3280_v53  ;;  %v1835_v53 = vld [vmem:[%s3859_s3 + $0x100] sm:$0xff] }
 0x435   :  { %v2737_v22 = vpack.c.bf16 %v1836_v21, %v1835_v53 }
 0x436   :  { %v727_v14 = vrot.slane %v723_v13, %v3195_v16 }
 0x438   :  { %v728_v18 = vmul.f32 %v727_v14, %v712_v63 }
 0x43a   :  { %v733_v19 = vadd.f32 %v732_v15, %v728_v18 }
 0x43c   :  { %2335 = vmatmul.mubr.f32.vlgmr.msra.gmra.mrb[6].mxu1 %v733_v19  ;;  %2370 = vmatmul.mubr.f32.vlgmr.msra.gmra.mrb[6].mxu0 %v733_v19 }
 0x43d   :  { %2373 = vmatpush3.msk.msra.mxu1 %vm92_vm0, %v1834_v20  ;;  %2374 = vmatprep.mubr.msk.f32.mxu1 %vm2925_vm2, %v2924_v0 }
 0x43e   :  { %2736 = vmatprep.subr.bf16.mxu1 %v2926_v6  ;;  %2444 = vmatprep.mubr.msk.f32.mxu0 %vm2925_vm2, %v2924_v0 }
 0x440   :  { %2375 = vmatmul.mubr.msk.f32.vlgmr.msra.gmra.mrb[8].mxu1 %vm88_vm1, %v2986_v2  ;;  %v1838_v2 = vld [vmem:[%s3859_s3 + $0x118] sm:$0xff] }
 0x441   :  { %2409 = vmatprep.mubr.msk.f32.mxu1 %vm2925_vm2, %v2924_v0  ;;  %2738 = vmatpush3.bf16.msra.mxu1 %v2737_v22  ;;  %v2740_v24 = vpack.c.bf16 %v1838_v2, %v1837_v23 }
 0x442   :  { %2739 = vmatprep.subr.bf16.mxu1 %v2926_v6 }
 0x445   :  { %2741 = vmatpush3.bf16.msra.mxu1 %v2740_v24 }
 0x446   :  { %2742 = vmatprep.subr.bf16.mxu1 %v2926_v6 }
 0x449   :  { %2744 = vmatpush3.bf16.msra.mxu1 %v2743_v25 }
 0x44a   :  { %2745 = vmatprep.subr.bf16.mxu1 %v2926_v6 }
 0x44d   :  { %2747 = vmatpush3.bf16.msra.mxu1 %v2746_v28 }
 0x44e   :  { %2748 = vmatprep.subr.bf16.mxu1 %v2926_v6 }
 0x451   :  { %2750 = vmatpush3.bf16.msra.mxu1 %v2749_v36 }
 0x452   :  { %2751 = vmatprep.subr.bf16.mxu1 %v2926_v6 }
 0x455   :  { %2753 = vmatpush3.bf16.msra.mxu1 %v2752_v39 }
 0x456   :  { %2754 = vmatprep.subr.bf16.mxu1 %v2926_v6 }
 0x459   :  { %2756 = vmatpush3.bf16.msra.mxu1 %v2755_v42 }
 0x45a   :  { %2757 = vmatprep.subr.bf16.mxu1 %v2926_v6 }
 0x45d   :  { %2759 = vmatpush3.bf16.msra.mxu1 %v2758_v46 }
 0x45e   :  { %2784 = vmatprep.subr.bf16.mxu1 %v2926_v6 }
 0x50f   :  { %v804_v50 = vpop.f32.mrb[6].mxu1  ;;  %v878_v51 = vpop.f32.mrb[6].mxu0 }
 0x510   :  { %v805_v56 = vadd.f32 %v804_v50, %v737_v48  ;;  %v2336_v57 = vpop.f32.mrb[7].mxu1  ;;  %v2371_v58 = vpop.f32.mrb[7].mxu0  ;;  %v879_v40 = vadd.f32 %v878_v51, %v811_v37  ;;  %v1867_v48 = vld [vmem:[%s3862_s5 + $0x100] sm:$0xff]  ;;  %v1868_v51 = vld [vmem:[%s3862_s5 + $0x108] sm:$0xff]  ;;  %v1866_v37 = vld [vmem:[%s3861_s4 + $0x178] sm:$0xff] }
 0x511   :  { %v1853_v57 = vld [vmem:[%s3861_s4 + $0x110] sm:$0xff]  ;;  %v1854_v58 = vld [vmem:[%s3861_s4 + $0x118] sm:$0xff] }
 0x512   :  { %v882_v60 = vadd.f32 2.0, %v805_v56  ;;  %v2785_v56 = vpack.c.bf16 %v1868_v51, %v1867_v48 }
 0x513   :  { %v1029_v61 = vpop.f32.mrb[8].mxu1 }
 0x514   :  { %v885_v62 = vand.u32 2147483647, %v882_v60  ;;  %v1030_v63 = vadd.f32 %v1029_v61, %v959_v59  ;;  %v2376_v1 = vpop.f32.mrb[9].mxu1  ;;  %v883_v21 = vsub.f32 0.0, %v882_v60  ;;  %v1869_v59 = vld [vmem:[%s3862_s5 + $0x110] sm:$0xff]  ;;  %v2764_v60 = vpack.c.bf16 %v1854_v58, %v1853_v57  ;;  %v1870_v61 = vld [vmem:[%s3862_s5 + $0x118] sm:$0xff] }
 0x515   :  { %v1856_v1 = vld [vmem:[%s3861_s4 + $0x128] sm:$0xff] }
 0x516   :  { %v886_v3 = vsub.f32 0.0, %v885_v62  ;;  %v1033_v4 = vmax.f32 %v1030_v63, 0.0  ;;  %v884_v24 = vmax.f32 %v883_v21, 0.0  ;;  %v2788_v62 = vpack.c.bf16 %v1870_v61, %v1869_v59  ;;  %v1855_v63 = vld [vmem:[%s3861_s4 + $0x120] sm:$0xff]  ;;  %v1861_v21 = vld [vmem:[%s3861_s4 + $0x150] sm:$0xff] }
 0x518   :  { %v887_v5 = vmul.f32 1.442695, %v886_v3  ;;  %v1034_v7 = vrot.slane %v1033_v4, 4  ;;  %v1871_v3 = vld [vmem:[%s3862_s5 + $0x120] sm:$0xff] }
 0x51a   :  { %2897 = vpow2.f32 %v887_v5  ;;  %v1035_v8 = vadd.f32 %v1034_v7, %v1033_v4  ;;  %v1872_v5 = vld [vmem:[%s3862_s5 + $0x128] sm:$0xff] }
 0x51b   :  { %v2791_v7 = vpack.c.bf16 %v1872_v5, %v1871_v3 }
 0x51c   :  { %v1036_v9 = vrot.slane %v1035_v8, 2 }
 0x51e   :  { %v1037_v10 = vadd.f32 %v1036_v9, %v1035_v8  ;;  %v1857_v8 = vld [vmem:[%s3861_s4 + $0x130] sm:$0xff]  ;;  %v1858_v9 = vld [vmem:[%s3861_s4 + $0x138] sm:$0xff] }
 0x520   :  { %v1038_v11 = vrot.slane %v1037_v10, 1 }
 0x522   :  { %v1039_v12 = vadd.f32 %v1038_v11, %v1037_v10  ;;  %v1873_v10 = vld [vmem:[%s3862_s5 + $0x130] sm:$0xff]  ;;  %v2770_v11 = vpack.c.bf16 %v1858_v9, %v1857_v8 }
 0x524   :  { %v2898_v13 = vpop.eup %2897  ;;  %v1040_v14 = vmul.f32 0.125, %v1039_v12  ;;  %v1874_v12 = vld [vmem:[%s3862_s5 + $0x138] sm:$0xff] }
 0x525   :  { %v889_v15 = vadd.f32 1.0, %v2898_v13  ;;  %v2794_v13 = vpack.c.bf16 %v1874_v12, %v1873_v10  ;;  %v1165_v10 = vrot.slane %v3495_v49, %v3198_v17 }
 0x526   :  { %v1041_v18 = vsub.f32 %v1033_v4, %v1040_v14  ;;  %v2767_v4 = vpack.c.bf16 %v1856_v1, %v1855_v63  ;;  %v1859_v14 = vld [vmem:[%s3861_s4 + $0x140] sm:$0xff] }
 0x527   :  { %2899 = vlog2.f32 %v889_v15  ;;  %v1860_v15 = vld [vmem:[%s3861_s4 + $0x148] sm:$0xff] }
 0x528   :  { %v1042_v19 = vmul.f32 %v1041_v18, %v1041_v18 }
 0x52a   :  { %v1043_v20 = vrot.slane %v1042_v19, 4 }
 0x52c   :  { %v1044_v53 = vadd.f32 %v1043_v20, %v1042_v19  ;;  %v2773_v19 = vpack.c.bf16 %v1860_v15, %v1859_v14  ;;  %v1876_v20 = vld [vmem:[%s3862_s5 + $0x148] sm:$0xff]  ;;  %v1888_v14 = vld [vmem:[%s3859_s3 + $0x180] sm:$0xff] }
 0x52d   :  { %v1889_v15 = vld [vmem:[%s3859_s3 + $0x188] sm:$0xff] }
 0x52e   :  { %v1045_v22 = vrot.slane %v1044_v53, 2 }
 0x530   :  { %v1046_v23 = vadd.f32 %v1045_v22, %v1044_v53  ;;  %v1862_v22 = vld [vmem:[%s3861_s4 + $0x158] sm:$0xff] }
 0x531   :  { %v2900_v2 = vpop.eup %2899 }
 0x532   :  { %v891_v29 = vmul.f32 0.6931472, %v2900_v2  ;;  %v1047_v31 = vrot.slane %v1046_v23, 1  ;;  %v2776_v2 = vpack.c.bf16 %v1862_v22, %v1861_v21  ;;  %v1892_v21 = vld [vmem:[%s3859_s3 + $0x1a0] sm:$0xff]  ;;  %v1893_v22 = vld [vmem:[%s3859_s3 + $0x1a8] sm:$0xff] }
 0x534   :  { %v892_v25 = vadd.f32 %v891_v29, %v884_v24  ;;  %v1048_v26 = vadd.f32 %v1047_v31, %v1046_v23  ;;  %v1877_v23 = vld [vmem:[%s3862_s5 + $0x150] sm:$0xff]  ;;  %v1878_v24 = vld [vmem:[%s3862_s5 + $0x158] sm:$0xff]  ;;  %v1863_v31 = vld [vmem:[%s3861_s4 + $0x160] sm:$0xff] }
 0x535   :  { %v2800_v29 = vpack.c.bf16 %v1878_v24, %v1877_v23  ;;  %v2815_v23 = vpack.c.bf16 %v1893_v22, %v1892_v21  ;;  %v1895_v24 = vld [vmem:[%s3859_s3 + $0x1b8] sm:$0xff] }
 0x536   :  { %v893_v27 = vsub.f32 0.0, %v892_v25  ;;  %v1049_v28 = vmul.f32 0.125, %v1048_v26  ;;  %v1864_v25 = vld [vmem:[%s3861_s4 + $0x168] sm:$0xff]  ;;  %v1879_v26 = vld [vmem:[%s3862_s5 + $0x160] sm:$0xff] }
 0x538   :  { %v894_v33 = vmul.f32 1.442695, %v893_v27  ;;  %v1050_v35 = vadd.f32 1e-05, %v1049_v28  ;;  %v3501_v36 = vadd.f32 %v893_v27, %v460_v34  ;;  %v2779_v27 = vpack.c.bf16 %v1864_v25, %v1863_v31  ;;  %v1880_v28 = vld [vmem:[%s3862_s5 + $0x168] sm:$0xff]  ;;  %v1896_v31 = vld [vmem:[%s3859_s3 + $0x1c0] sm:$0xff] }
 0x539   :  { %v1897_v25 = vld [vmem:[%s3859_s3 + $0x1c8] sm:$0xff] }
 0x53a   :  { %2901 = vpow2.f32 %v894_v33  ;;  %v2803_v33 = vpack.c.bf16 %v1880_v28, %v1879_v26  ;;  %v2821_v26 = vpack.c.bf16 %v1897_v25, %v1896_v31  ;;  %v1899_v28 = vld [vmem:[%s3859_s3 + $0x1d8] sm:$0xff] }
 0x53b   :  { %2903 = vrsqrt.f32 %v1050_v35  ;;  %v1865_v35 = vld [vmem:[%s3861_s4 + $0x170] sm:$0xff] }
 0x544   :  { %v2902_v38 = vpop.eup %2901 }
 0x545   :  { %v2904_v39 = vpop.eup %2903  ;;  %v896_v41 = vmul.f32 %v2902_v38, %v3294_v45  ;;  %v1852_v45 = vld [vmem:[%s3861_s4 + $0x108] sm:$0xff]  ;;  %v1881_v38 = vld [vmem:[%s3862_s5 + $0x170] sm:$0xff] }
 0x546   :  { %v1052_v42 = vmul.f32 %v2904_v39, %v3495_v49  ;;  %v2761_v50 = vpack.c.bf16 %v1852_v45, %v1851_v47  ;;  %v2782_v39 = vpack.c.bf16 %v1866_v37, %v1865_v35  ;;  %v1900_v35 = vld [vmem:[%s3859_s3 + $0x1e0] sm:$0xff]  ;;  %v1901_v37 = vld [vmem:[%s3859_s3 + $0x1e8] sm:$0xff] }
 0x547   :  { %v3506_v43 = vadd.f32 %v896_v41, %v879_v40  ;;  %v1882_v40 = vld [vmem:[%s3862_s5 + $0x178] sm:$0xff] }
 0x548   :  { %v1056_v44 = vrot.slane %v1052_v42, %v3066_v54  ;;  %2762 = vmatpush3.bf16.msra.mxu0 %v2761_v50  ;;  %v2806_v41 = vpack.c.bf16 %v1882_v40, %v1881_v38  ;;  %v1066_v42 = vrot.slane %v3495_v49, %v3190_v52  ;;  %v2827_v38 = vpack.c.bf16 %v1901_v37, %v1900_v35  ;;  %v1903_v40 = vld [vmem:[%s3859_s3 + $0x1f8] sm:$0xff] }
 0x549   :  { %2763 = vmatprep.subr.bf16.mxu0 %v2926_v6 }
 0x54a   :  { %v1057_v34 = vmul.f32 %v1056_v44, %v1041_v18  ;;  %v1875_v18 = vld [vmem:[%s3862_s5 + $0x140] sm:$0xff] }
 0x54b   :  { %v2797_v53 = vpack.c.bf16 %v1876_v20, %v1875_v18  ;;  %v2809_v18 = vpack.c.bf16 %v1889_v15, %v1888_v14  ;;  %v1891_v20 = vld [vmem:[%s3859_s3 + $0x198] sm:$0xff] }
 0x54c   :  { %v1062_v46 = vadd.f32 %v1061_v32, %v1057_v34  ;;  %2765 = vmatpush3.bf16.msra.mxu0 %v2764_v60 }
 0x54d   :  { %2766 = vmatprep.subr.bf16.mxu0 %v2926_v6 }
 0x54e   :  { %2410 = vmatmul.mubr.f32.vlgmr.msra.gmra.mrb[10].mxu1 %v1062_v46 }
 0x54f   :  { %2479 = vmatprep.mubr.msk.f32.mxu1 %vm2925_vm2, %v2924_v0  ;;  %2786 = vmatpush3.bf16.msra.mxu1 %v2785_v56 }
 0x550   :  { %2787 = vmatprep.subr.bf16.mxu1 %v2926_v6  ;;  %2768 = vmatpush3.bf16.msra.mxu0 %v2767_v4 }
 0x551   :  { %2769 = vmatprep.subr.bf16.mxu0 %v2926_v6 }
 0x553   :  { %2789 = vmatpush3.bf16.msra.mxu1 %v2788_v62 }
 0x554   :  { %2790 = vmatprep.subr.bf16.mxu1 %v2926_v6  ;;  %2771 = vmatpush3.bf16.msra.mxu0 %v2770_v11 }
 0x555   :  { %2772 = vmatprep.subr.bf16.mxu0 %v2926_v6 }
 0x557   :  { %2792 = vmatpush3.bf16.msra.mxu1 %v2791_v7 }
 0x558   :  { %2793 = vmatprep.subr.bf16.mxu1 %v2926_v6  ;;  %2774 = vmatpush3.bf16.msra.mxu0 %v2773_v19  ;;  %v1890_v19 = vld [vmem:[%s3859_s3 + $0x190] sm:$0xff] }
 0x559   :  { %2775 = vmatprep.subr.bf16.mxu0 %v2926_v6 }
 0x55b   :  { %2795 = vmatpush3.bf16.msra.mxu1 %v2794_v13  ;;  %v1887_v13 = vld [vmem:[%s3857_s2 + $0xc] sm:$0xf] }
 0x55c   :  { %2796 = vmatprep.subr.bf16.mxu1 %v2926_v6  ;;  %2777 = vmatpush3.bf16.msra.mxu0 %v2776_v2  ;;  %v1894_v2 = vld [vmem:[%s3859_s3 + $0x1b0] sm:$0xff] }
 0x55d   :  { %2778 = vmatprep.subr.bf16.mxu0 %v2926_v6 }
 0x55f   :  { %2798 = vmatpush3.bf16.msra.mxu1 %v2797_v53  ;;  %v2812_v53 = vpack.c.bf16 %v1891_v20, %v1890_v19 }
 0x560   :  { %2799 = vmatprep.subr.bf16.mxu1 %v2926_v6  ;;  %2780 = vmatpush3.bf16.msra.mxu0 %v2779_v27  ;;  %v1898_v27 = vld [vmem:[%s3859_s3 + $0x1d0] sm:$0xff] }
 0x561   :  { %2781 = vmatprep.subr.bf16.mxu0 %v2926_v6 }
 0x563   :  { %2801 = vmatpush3.bf16.msra.mxu1 %v2800_v29  ;;  %v2818_v29 = vpack.c.bf16 %v1895_v24, %v1894_v2 }
 0x564   :  { %2802 = vmatprep.subr.bf16.mxu1 %v2926_v6  ;;  %2783 = vmatpush3.bf16.msra.mxu0 %v2782_v39  ;;  %v1902_v39 = vld [vmem:[%s3859_s3 + $0x1f0] sm:$0xff] }
 0x565   :  { %2482 = vmatprep.subr.mxu0 %v2924_v0 }
 0x567   :  { %2804 = vmatpush3.bf16.msra.mxu1 %v2803_v33  ;;  %v2824_v33 = vpack.c.bf16 %v1899_v28, %v1898_v27 }
 0x568   :  { %2805 = vmatprep.subr.bf16.mxu1 %v2926_v6 }
 0x56b   :  { %2807 = vmatpush3.bf16.msra.mxu1 %v2806_v41  ;;  %v2830_v41 = vpack.c.bf16 %v1903_v40, %v1902_v39 }
 0x56c   :  { %2832 = vmatprep.subr.bf16.mxu1 %v2926_v6 }
 0x621   :  { %v1133_v44 = vpop.f32.mrb[10].mxu1 }
 0x622   :  { %v1134_v32 = vadd.f32 %v1133_v44, %v1066_v42  ;;  %v2411_v34 = vpop.f32.mrb[11].mxu1  ;;  %v1884_v42 = vld [vmem:[%s3863_s7 + $0x4] sm:$0x3] }
 0x623   :  { %v1170_v44 = vrot.slane %v1884_v42, %v3056_v30 }
 0x624   :  { %v1137_v46 = vmax.f32 %v1134_v32, 0.0  ;;  %v3709_v32 = vld [vmem:[%s3860_s6 + $0x18] sm:$0xff] }
 0x625   :  { %v1494_v40 = vrot.slane %v3709_v32, %v3069_v55  ;;  %v1921_v55 = vld [vmem:[%s3862_s5 + $0x188] sm:$0xff] }
 0x626   :  { %v1138_v47 = vrot.slane %v1137_v46, 4 }
 0x628   :  { %v1139_v45 = vadd.f32 %v1138_v47, %v1137_v46 }
 0x62a   :  { %v1140_v48 = vrot.slane %v1139_v45, 2 }
 0x62c   :  { %v1141_v50 = vadd.f32 %v1140_v48, %v1139_v45 }
 0x62e   :  { %v1142_v51 = vrot.slane %v1141_v50, 1 }
 0x630   :  { %v1143_v56 = vadd.f32 %v1142_v51, %v1141_v50  ;;  %v1392_v50 = vrot.slane %v3709_v32, %v3056_v30 }
 0x632   :  { %v1144_v57 = vmul.f32 0.125, %v1143_v56 }
 0x634   :  { %v1145_v58 = vsub.f32 %v1137_v46, %v1144_v57 }
 0x636   :  { %v1146_v59 = vmul.f32 %v1145_v58, %v1145_v58 }
 0x638   :  { %v1147_v60 = vrot.slane %v1146_v59, 4 }
 0x63a   :  { %v1148_v61 = vadd.f32 %v1147_v60, %v1146_v59 }
 0x63c   :  { %v1149_v62 = vrot.slane %v1148_v61, 2 }
 0x63e   :  { %v1150_v63 = vadd.f32 %v1149_v62, %v1148_v61 }
 0x640   :  { %v1151_v1 = vrot.slane %v1150_v63, 1 }
 0x642   :  { %v1152_v3 = vadd.f32 %v1151_v1, %v1150_v63 }
 0x644   :  { %v1153_v4 = vmul.f32 0.125, %v1152_v3 }
 0x646   :  { %v1154_v5 = vadd.f32 1e-05, %v1153_v4 }
 0x648   :  { %2905 = vrsqrt.f32 %v1154_v5 }
 0x652   :  { %v2906_v7 = vpop.eup %2905 }
 0x653   :  { %v1156_v8 = vmul.f32 %v2906_v7, %v3495_v49  ;;  %v2923_v49 = vld [vmem:[%s3858_s0] sm:$0xff] }
 0x655   :  { %v1160_v9 = vrot.slane %v1156_v8, %v3195_v16 }
 0x657   :  { %v1161_v11 = vmul.f32 %v1160_v9, %v1145_v58 }
 0x659   :  { %v1166_v12 = vadd.f32 %v1165_v10, %v1161_v11 }
 0x65b   :  { %2445 = vmatmul.mubr.f32.vlgmr.msra.gmra.mrb[8].mxu0 %v1166_v12  ;;  %2480 = vmatmul.mubr.f32.vlgmr.msra.gmra.mrb[12].mxu1 %v1166_v12 }
 0x65c   :  { %2483 = vmatpush3.msk.msra.mxu0 %vm92_vm0, %v1887_v13  ;;  %2484 = vmatprep.mubr.msk.f32.mxu0 %vm2925_vm2, %v2924_v0 }
 0x65d   :  { %2808 = vmatprep.subr.bf16.mxu0 %v2926_v6  ;;  %2554 = vmatprep.mubr.msk.f32.mxu1 %vm2925_vm2, %v2924_v0 }
 0x65f   :  { %2485 = vmatmul.mubr.msk.f32.vlgmr.msra.gmra.mrb[10].mxu0 %vm88_vm1, %v2923_v49 }
 0x660   :  { %2519 = vmatprep.mubr.msk.f32.mxu0 %vm2925_vm2, %v2924_v0  ;;  %2810 = vmatpush3.bf16.msra.mxu0 %v2809_v18 }
 0x661   :  { %2811 = vmatprep.subr.bf16.mxu0 %v2926_v6 }
 0x664   :  { %2813 = vmatpush3.bf16.msra.mxu0 %v2812_v53 }
 0x665   :  { %2814 = vmatprep.subr.bf16.mxu0 %v2926_v6 }
 0x668   :  { %2816 = vmatpush3.bf16.msra.mxu0 %v2815_v23 }
 0x669   :  { %2817 = vmatprep.subr.bf16.mxu0 %v2926_v6 }
 0x66c   :  { %2819 = vmatpush3.bf16.msra.mxu0 %v2818_v29 }
 0x66d   :  { %2820 = vmatprep.subr.bf16.mxu0 %v2926_v6 }
 0x670   :  { %2822 = vmatpush3.bf16.msra.mxu0 %v2821_v26  ;;  %v1244_v26 = vrot.slane %v1884_v42, %v3066_v54  ;;  %v1904_v42 = vld [vmem:[%s3861_s4 + $0x180] sm:$0xff] }
 0x671   :  { %2823 = vmatprep.subr.bf16.mxu0 %v2926_v6 }
 0x674   :  { %2825 = vmatpush3.bf16.msra.mxu0 %v2824_v33 }
 0x675   :  { %2826 = vmatprep.subr.bf16.mxu0 %v2926_v6 }
 0x678   :  { %2828 = vmatpush3.bf16.msra.mxu0 %v2827_v38 }
 0x679   :  { %2829 = vmatprep.subr.bf16.mxu0 %v2926_v6 }
 0x67c   :  { %2831 = vmatpush3.bf16.msra.mxu0 %v2830_v41 }
 0x67d   :  { %2856 = vmatprep.subr.bf16.mxu0 %v2926_v6 }
 0x72e   :  { %v1237_v34 = vpop.f32.mrb[8].mxu0  ;;  %v1311_v46 = vpop.f32.mrb[12].mxu1 }
 0x72f   :  { %v1238_v47 = vadd.f32 %v1237_v34, %v1170_v44  ;;  %v2446_v45 = vpop.f32.mrb[9].mxu0  ;;  %v2481_v48 = vpop.f32.mrb[13].mxu1  ;;  %v1312_v33 = vadd.f32 %v1311_v46, %v1244_v26  ;;  %v1920_v44 = vld [vmem:[%s3862_s5 + $0x180] sm:$0xff] }
 0x730   :  { %v2857_v46 = vpack.c.bf16 %v1921_v55, %v1920_v44  ;;  %v1922_v45 = vld [vmem:[%s3862_s5 + $0x190] sm:$0xff] }
 0x731   :  { %v1315_v51 = vadd.f32 2.0, %v1238_v47  ;;  %v1907_v47 = vld [vmem:[%s3861_s4 + $0x198] sm:$0xff] }
 0x732   :  { %v1462_v56 = vpop.f32.mrb[10].mxu0 }
 0x733   :  { %v1318_v57 = vand.u32 2147483647, %v1315_v51  ;;  %v1463_v58 = vadd.f32 %v1462_v56, %v1392_v50  ;;  %v2486_v59 = vpop.f32.mrb[11].mxu0  ;;  %v1316_v14 = vsub.f32 0.0, %v1315_v51  ;;  %v1923_v50 = vld [vmem:[%s3862_s5 + $0x198] sm:$0xff]  ;;  %v1908_v56 = vld [vmem:[%s3861_s4 + $0x1a0] sm:$0xff] }
 0x734   :  { %v2860_v51 = vpack.c.bf16 %v1923_v50, %v1922_v45 }
 0x735   :  { %v1319_v60 = vsub.f32 0.0, %v1318_v57  ;;  %v1466_v61 = vmax.f32 %v1463_v58, 0.0  ;;  %v1317_v20 = vmax.f32 %v1316_v14, 0.0  ;;  %v1909_v57 = vld [vmem:[%s3861_s4 + $0x1a8] sm:$0xff]  ;;  %v1924_v58 = vld [vmem:[%s3862_s5 + $0x1a0] sm:$0xff]  ;;  %v1930_v14 = vld [vmem:[%s3862_s5 + $0x1d0] sm:$0xff] }
 0x736   :  { %v2839_v59 = vpack.c.bf16 %v1909_v57, %v1908_v56 }
 0x737   :  { %v1320_v62 = vmul.f32 1.442695, %v1319_v60  ;;  %v1467_v63 = vrot.slane %v1466_v61, 4  ;;  %v1925_v60 = vld [vmem:[%s3862_s5 + $0x1a8] sm:$0xff] }
 0x739   :  { %2907 = vpow2.f32 %v1320_v62  ;;  %v1468_v1 = vadd.f32 %v1467_v63, %v1466_v61  ;;  %v1910_v62 = vld [vmem:[%s3861_s4 + $0x1b0] sm:$0xff]  ;;  %v1911_v63 = vld [vmem:[%s3861_s4 + $0x1b8] sm:$0xff] }
 0x73b   :  { %v1469_v3 = vrot.slane %v1468_v1, 2 }
 0x73d   :  { %v1470_v4 = vadd.f32 %v1469_v3, %v1468_v1  ;;  %v1926_v1 = vld [vmem:[%s3862_s5 + $0x1b0] sm:$0xff]  ;;  %v2842_v3 = vpack.c.bf16 %v1911_v63, %v1910_v62  ;;  %v1937_v63 = vld [vmem:[%s3863_s7 + $0x6] sm:$0x3] }
 0x73f   :  { %v1471_v5 = vrot.slane %v1470_v4, 1 }
 0x741   :  { %v1472_v7 = vadd.f32 %v1471_v5, %v1470_v4  ;;  %v1927_v4 = vld [vmem:[%s3862_s5 + $0x1b8] sm:$0xff] }
 0x742   :  { %v2866_v5 = vpack.c.bf16 %v1927_v4, %v1926_v1  ;;  %v1603_v1 = vrot.slane %v1937_v63, %v3056_v30 }
 0x743   :  { %v2908_v8 = vpop.eup %2907  ;;  %v1473_v9 = vmul.f32 0.125, %v1472_v7  ;;  %v1912_v7 = vld [vmem:[%s3861_s4 + $0x1c0] sm:$0xff] }
 0x744   :  { %v1322_v10 = vadd.f32 1.0, %v2908_v8  ;;  %v1913_v8 = vld [vmem:[%s3861_s4 + $0x1c8] sm:$0xff] }
 0x745   :  { %v1474_v11 = vsub.f32 %v1466_v61, %v1473_v9  ;;  %v2863_v61 = vpack.c.bf16 %v1925_v60, %v1924_v58  ;;  %v1928_v9 = vld [vmem:[%s3862_s5 + $0x1c0] sm:$0xff]  ;;  %v1598_v60 = vrot.slane %v3709_v32, %v3198_v17 }
 0x746   :  { %2909 = vlog2.f32 %v1322_v10  ;;  %v2845_v10 = vpack.c.bf16 %v1913_v8, %v1912_v7 }
 0x747   :  { %v1475_v12 = vmul.f32 %v1474_v11, %v1474_v11 }
 0x749   :  { %v1476_v13 = vrot.slane %v1475_v12, 4 }
 0x74b   :  { %v1477_v49 = vadd.f32 %v1476_v13, %v1475_v12  ;;  %v1914_v13 = vld [vmem:[%s3861_s4 + $0x1d0] sm:$0xff] }
 0x74d   :  { %v1478_v15 = vrot.slane %v1477_v49, 2 }
 0x74f   :  { %v1479_v18 = vadd.f32 %v1478_v15, %v1477_v49  ;;  %v1915_v49 = vld [vmem:[%s3861_s4 + $0x1d8] sm:$0xff] }
 0x750   :  { %v2910_v19 = vpop.eup %2909  ;;  %v2848_v15 = vpack.c.bf16 %v1915_v49, %v1914_v13 }
 0x751   :  { %v1324_v53 = vmul.f32 0.6931472, %v2910_v19  ;;  %v1480_v21 = vrot.slane %v1479_v18, 1 }
 0x753   :  { %v1325_v22 = vadd.f32 %v1324_v53, %v1317_v20  ;;  %v1481_v23 = vadd.f32 %v1480_v21, %v1479_v18  ;;  %v1931_v18 = vld [vmem:[%s3862_s5 + $0x1d8] sm:$0xff]  ;;  %v1916_v20 = vld [vmem:[%s3861_s4 + $0x1e0] sm:$0xff]  ;;  %v1917_v53 = vld [vmem:[%s3861_s4 + $0x1e8] sm:$0xff] }
 0x754   :  { %v2872_v19 = vpack.c.bf16 %v1931_v18, %v1930_v14  ;;  %v1932_v21 = vld [vmem:[%s3862_s5 + $0x1e0] sm:$0xff] }
 0x755   :  { %v1326_v2 = vsub.f32 0.0, %v1325_v22  ;;  %v1482_v24 = vmul.f32 0.125, %v1481_v23  ;;  %v2851_v22 = vpack.c.bf16 %v1917_v53, %v1916_v20  ;;  %v1933_v23 = vld [vmem:[%s3862_s5 + $0x1e8] sm:$0xff]  ;;  %v1677_v53 = vrot.slane %v1937_v63, %v3066_v54 }
 0x757   :  { %v1327_v29 = vmul.f32 1.442695, %v1326_v2  ;;  %v1483_v31 = vadd.f32 1e-05, %v1482_v24  ;;  %v3714_v25 = vadd.f32 %v1326_v2, %v3501_v36  ;;  %v2875_v2 = vpack.c.bf16 %v1933_v23, %v1932_v21  ;;  %v1918_v24 = vld [vmem:[%s3861_s4 + $0x1f0] sm:$0xff] }
 0x759   :  { %2911 = vpow2.f32 %v1327_v29  ;;  %v1919_v29 = vld [vmem:[%s3861_s4 + $0x1f8] sm:$0xff] }
 0x75a   :  { %2913 = vrsqrt.f32 %v1483_v31  ;;  %v1934_v31 = vld [vmem:[%s3862_s5 + $0x1f0] sm:$0xff]  ;;  %v2854_v26 = vpack.c.bf16 %v1919_v29, %v1918_v24 }
 0x763   :  { %v2912_v27 = vpop.eup %2911 }
 0x764   :  { %v2914_v28 = vpop.eup %2913  ;;  %v1329_v35 = vmul.f32 %v2912_v27, %v3506_v43  ;;  %v1905_v43 = vld [vmem:[%s3861_s4 + $0x188] sm:$0xff]  ;;  %v1935_v27 = vld [vmem:[%s3862_s5 + $0x1f8] sm:$0xff] }
 0x765   :  { %v1485_v37 = vmul.f32 %v2914_v28, %v3709_v32  ;;  %v2833_v34 = vpack.c.bf16 %v1905_v43, %v1904_v42  ;;  %v2878_v28 = vpack.c.bf16 %v1935_v27, %v1934_v31 }
 0x766   :  { %v3719_v38 = vadd.f32 %v1329_v35, %v1312_v33  ;;  %v1499_v33 = vrot.slane %v3709_v32, %v3190_v52 }
 0x767   :  { %v1489_v39 = vrot.slane %v1485_v37, %v3066_v54  ;;  %2834 = vmatpush3.bf16.msra.mxu1 %v2833_v34 }
 0x768   :  { %2835 = vmatprep.subr.bf16.mxu1 %v2926_v6 }
 0x769   :  { %v1490_v36 = vmul.f32 %v1489_v39, %v1474_v11  ;;  %v1929_v11 = vld [vmem:[%s3862_s5 + $0x1c8] sm:$0xff] }
 0x76a   :  { %v2869_v12 = vpack.c.bf16 %v1929_v11, %v1928_v9 }
 0x76b   :  { %v1495_v41 = vadd.f32 %v1494_v40, %v1490_v36 }
 0x76d   :  { %2520 = vmatmul.mubr.f32.vlgmr.msra.gmra.mrb[12].mxu0 %v1495_v41 }
 0x76e   :  { %2589 = vmatprep.mubr.msk.f32.mxu0 %vm2925_vm2, %v2924_v0  ;;  %2858 = vmatpush3.bf16.msra.mxu0 %v2857_v46  ;;  %v1906_v0 = vld [vmem:[%s3861_s4 + $0x190] sm:$0xff] }
 0x76f   :  { %2859 = vmatprep.subr.bf16.mxu0 %v2926_v6  ;;  %v2836_v48 = vpack.c.bf16 %v1907_v47, %v1906_v0 }
 0x771   :  { %2837 = vmatpush3.bf16.msra.mxu1 %v2836_v48 }
 0x772   :  { %2861 = vmatpush3.bf16.msra.mxu0 %v2860_v51  ;;  %2838 = vmatprep.subr.bf16.mxu1 %v2926_v6 }
 0x773   :  { %2862 = vmatprep.subr.bf16.mxu0 %v2926_v6 }
 0x775   :  { %2840 = vmatpush3.bf16.msra.mxu1 %v2839_v59 }
 0x776   :  { %2864 = vmatpush3.bf16.msra.mxu0 %v2863_v61  ;;  %2841 = vmatprep.subr.bf16.mxu1 %v2926_v6 }
 0x777   :  { %2865 = vmatprep.subr.bf16.mxu0 %v2926_v6 }
 0x779   :  { %2843 = vmatpush3.bf16.msra.mxu1 %v2842_v3 }
 0x77a   :  { %2867 = vmatpush3.bf16.msra.mxu0 %v2866_v5  ;;  %2844 = vmatprep.subr.bf16.mxu1 %v2926_v6 }
 0x77b   :  { %2868 = vmatprep.subr.bf16.mxu0 %v2926_v6 }
 0x77d   :  { %2846 = vmatpush3.bf16.msra.mxu1 %v2845_v10 }
 0x77e   :  { %2870 = vmatpush3.bf16.msra.mxu0 %v2869_v12  ;;  %2847 = vmatprep.subr.bf16.mxu1 %v2926_v6 }
 0x77f   :  { %2871 = vmatprep.subr.bf16.mxu0 %v2926_v6 }
 0x781   :  { %2849 = vmatpush3.bf16.msra.mxu1 %v2848_v15 }
 0x782   :  { %2873 = vmatpush3.bf16.msra.mxu0 %v2872_v19  ;;  %2850 = vmatprep.subr.bf16.mxu1 %v2926_v6 }
 0x783   :  { %2874 = vmatprep.subr.bf16.mxu0 %v2926_v6 }
 0x785   :  { %2852 = vmatpush3.bf16.msra.mxu1 %v2851_v22 }
 0x786   :  { %2876 = vmatpush3.bf16.msra.mxu0 %v2875_v2  ;;  %2853 = vmatprep.subr.bf16.mxu1 %v2926_v6 }
 0x787   :  { %2877 = vmatprep.subr.bf16.mxu0 %v2926_v6 }
 0x789   :  { %2855 = vmatpush3.bf16.msra.mxu1 %v2854_v26 }
 0x78a   :  { %2879 = vmatpush3.bf16.msra.mxu0 %v2878_v28 }
 0x840   :  { %v1566_v35 = vpop.f32.mrb[12].mxu0 }
 0x841   :  { %v1567_v37 = vadd.f32 %v1566_v35, %v1499_v33  ;;  %v2521_v39 = vpop.f32.mrb[13].mxu0 }
 0x843   :  { %v1570_v40 = vmax.f32 %v1567_v37, 0.0 }
 0x845   :  { %v1571_v36 = vrot.slane %v1570_v40, 4 }
 0x847   :  { %v1572_v41 = vadd.f32 %v1571_v36, %v1570_v40 }
 0x849   :  { %v1573_v42 = vrot.slane %v1572_v41, 2 }
 0x84b   :  { %v1574_v43 = vadd.f32 %v1573_v42, %v1572_v41 }
 0x84d   :  { %v1575_v6 = vrot.slane %v1574_v43, 1 }
 0x84f   :  { %v1576_v44 = vadd.f32 %v1575_v6, %v1574_v43 }
 0x851   :  { %v1577_v34 = vmul.f32 0.125, %v1576_v44 }
 0x853   :  { %v1578_v55 = vsub.f32 %v1570_v40, %v1577_v34 }
 0x855   :  { %v1579_v46 = vmul.f32 %v1578_v55, %v1578_v55 }
 0x857   :  { %v1580_v0 = vrot.slane %v1579_v46, 4 }
 0x859   :  { %v1581_v47 = vadd.f32 %v1580_v0, %v1579_v46 }
 0x85b   :  { %v1582_v45 = vrot.slane %v1581_v47, 2 }
 0x85d   :  { %v1583_v48 = vadd.f32 %v1582_v45, %v1581_v47 }
 0x85f   :  { %v1584_v50 = vrot.slane %v1583_v48, 1 }
 0x861   :  { %v1585_v51 = vadd.f32 %v1584_v50, %v1583_v48 }
 0x863   :  { %v1586_v52 = vmul.f32 0.125, %v1585_v51 }
 0x865   :  { %v1587_v56 = vadd.f32 1e-05, %v1586_v52 }
 0x867   :  { %2915 = vrsqrt.f32 %v1587_v56 }
 0x871   :  { %v2916_v57 = vpop.eup %2915 }
 0x872   :  { %v1589_v58 = vmul.f32 %v2916_v57, %v3709_v32 }
 0x874   :  { %v1593_v59 = vrot.slane %v1589_v58, %v3195_v16 }
 0x876   :  { %v1594_v61 = vmul.f32 %v1593_v59, %v1578_v55 }
 0x878   :  { %v1599_v62 = vadd.f32 %v1598_v60, %v1594_v61 }
 0x87a   :  { %2555 = vmatmul.mubr.f32.vlgmr.msra.gmra.mrb[14].mxu1 %v1599_v62  ;;  %2590 = vmatmul.mubr.f32.vlgmr.msra.gmra.mrb[14].mxu0 %v1599_v62 }
 0x94d   :  { %v1670_v3 = vpop.f32.mrb[14].mxu1  ;;  %v1744_v4 = vpop.f32.mrb[14].mxu0 }
 0x94e   :  { %v1671_v5 = vadd.f32 %v1670_v3, %v1603_v1  ;;  %v2556_v7 = vpop.f32.mrb[15].mxu1  ;;  %v2591_v8 = vpop.f32.mrb[15].mxu0  ;;  %v1745_v22 = vadd.f32 %v1744_v4, %v1677_v53 }
 0x950   :  { %v1748_v9 = vadd.f32 2.0, %v1671_v5 }
 0x952   :  { %v1751_v16 = vand.u32 2147483647, %v1748_v9  ;;  %v1749_v12 = vsub.f32 0.0, %v1748_v9 }
 0x954   :  { %v1752_v10 = vsub.f32 0.0, %v1751_v16  ;;  %v1750_v49 = vmax.f32 %v1749_v12, 0.0 }
 0x956   :  { %v1753_v11 = vmul.f32 1.442695, %v1752_v10 }
 0x958   :  { %2917 = vpow2.f32 %v1753_v11 }
 0x962   :  { %v2918_v17 = vpop.eup %2917 }
 0x963   :  { %v1755_v32 = vadd.f32 1.0, %v2918_v17 }
 0x965   :  { %2919 = vlog2.f32 %v1755_v32 }
 0x96f   :  { %v2920_v13 = vpop.eup %2919 }
 0x970   :  { %v1757_v14 = vmul.f32 0.6931472, %v2920_v13 }
 0x972   :  { %v1758_v15 = vadd.f32 %v1757_v14, %v1750_v49 }
 0x974   :  { %v1759_v18 = vsub.f32 0.0, %v1758_v15 }
 0x976   :  { %v1760_v30 = vmul.f32 1.442695, %v1759_v18  ;;  %v1764_v19 = vadd.f32 %v1759_v18, %v3714_v25 }
 0x978   :  { %2921 = vpow2.f32 %v1760_v30  ;;  %v1766_v20 = vsel %vm88_vm1, %v1764_v19, 0.0 }
 0x979   :  { %1767 = vadd.xlane.f32.xlu0 %v1766_v20 }
 0x982   :  { %v2922_v21 = vpop.eup %2921 }
 0x983   :  { %v1762_v23 = vmul.f32 %v2922_v21, %v3719_v38 }
 0x985   :  { %v1763_v2 = vadd.f32 %v1762_v23, %v1745_v22 }
 0x987   :  { %1765 = vst.msk [vmem:[%s3865_s8] sm:$0xff] %vm88_vm1, %v1763_v2 }
 0xa06   :  { %v1768_v24 = vpop.xlane.xlu0 %1767 }
 0xa07   :  { %1770 = vst.msk [vmem:[%s3866_s9] sm:$0xff] %vm1769_vm3, %v1768_v24 }

</bundles_post_ra>
